<compile_context>
chip_gen: v5e
topology: v5e:2x2
jax: 0.10.0
libtpu: 0.0.40
codegen_flags: <defaults>
</compile_context>

<pallas_src>
import jax
import jax.numpy as jnp
from jax import lax
from jax.experimental import pallas as pl
from jax.experimental.pallas import tpu as pltpu


def conv1x1_sigmoid_kernel(x_ref, w_ref, b_ref, o_ref):
    # x_ref: (M, Cin) f32   — cast to bf16 in-kernel (VPU, free)
    # w_ref: (Cin, Cout) bf16 — pre-transposed offline, MXU-ready layout
    # b_ref: (1, Cout) f32
    # o_ref: (M, Cout) f32
    x_bf = x_ref[...].astype(jnp.bfloat16)
    acc = jnp.dot(x_bf, w_ref[...], preferred_element_type=jnp.float32)
    acc = acc + b_ref[...]
    o_ref[...] = jax.nn.sigmoid(acc).astype(o_ref.dtype)


def prepare_params(weight, bias, compute_dtype=jnp.bfloat16):
    """One-time parameter prep (outside the hot path).

    weight: [Cout, Cin, 1, 1] -> (Cin, Cout) in `compute_dtype` (transposed once)
    bias:   [Cout]            -> (1, Cout) f32
    """
    Cout, Cin = weight.shape[0], weight.shape[1]
    w_mat = jnp.transpose(weight.reshape(Cout, Cin), (1, 0)).astype(compute_dtype)
    b_mat = bias.reshape(1, Cout).astype(jnp.float32)
    return w_mat, b_mat


def conv2d_1x1_sigmoid(x_nchw, w_mat, b_mat):
    """x_nchw: [N, Cin, H, W] f32; w_mat: (Cin, Cout) bf16; b_mat: (1, Cout) f32."""
    N, Cin, H, W = x_nchw.shape
    Cout = w_mat.shape[1]
    M = N * H * W

    # Glue: NCHW -> (N*H*W, Cin).  With H=W=1 this is a pure reshape (bitcast).
    if H == 1 and W == 1:
        x_mat = x_nchw.reshape(M, Cin)
    else:
        x_mat = jnp.transpose(x_nchw, (0, 2, 3, 1)).reshape(M, Cin)
    # NOTE: no wrapper-side cast — x stays f32, cast happens inside the kernel.

    w_itemsize = jnp.dtype(w_mat.dtype).itemsize
    x_itemsize = jnp.dtype(x_mat.dtype).itemsize
    cost = pl.CostEstimate(
        flops=2 * M * Cin * Cout,
        transcendentals=2 * M * Cout,                 # sigmoid ~= exp + recip
        bytes_accessed=(Cin * Cout * w_itemsize       # weight (dominant, bf16)
                        + M * Cin * x_itemsize        # activations (f32)
                        + Cout * 4                    # bias (f32)
                        + M * Cout * 4),              # output (f32)
    )

    out_mat = pl.pallas_call(
        conv1x1_sigmoid_kernel,
        out_shape=jax.ShapeDtypeStruct((M, Cout), jnp.float32),
        grid_spec=pltpu.PrefetchScalarGridSpec(
            num_scalar_prefetch=0,
            grid=(),
            # Single full-array blocks (full-extent blocks satisfy tiling
            # rules); resident footprint ~1 MB << scoped VMEM on all gens.
            in_specs=[
                pl.BlockSpec((M, Cin), lambda: (0, 0)),
                pl.BlockSpec((Cin, Cout), lambda: (0, 0)),
                pl.BlockSpec((1, Cout), lambda: (0, 0)),
            ],
            out_specs=pl.BlockSpec((M, Cout), lambda: (0, 0)),
        ),
        cost_estimate=cost,
    )(x_mat, w_mat, b_mat)

    # Glue: (N*H*W, Cout) -> NCHW (pure reshape when H=W=1).
    if H == 1 and W == 1:
        return out_mat.reshape(N, Cout, H, W)
    return jnp.transpose(out_mat.reshape(N, H, W, Cout), (0, 3, 1, 2))


if __name__ == "__main__":
    key = jax.random.PRNGKey(0)
    k_x, k_w, k_b = jax.random.split(key, 3)

    # Shapes implied by the module: input [1, 348, 1, 1], Conv2d(348 -> 1392, k=1).
    N, Cin, H, W = 1, 348, 1, 1
    Cout = 1392

    # Deterministic synthetic parameters (PyTorch-like uniform init bounds).
    bound = 1.0 / (Cin ** 0.5)
    x = jax.random.normal(k_x, (N, Cin, H, W), dtype=jnp.float32)
    weight = jax.random.uniform(k_w, (Cout, Cin, 1, 1), dtype=jnp.float32,
                                minval=-bound, maxval=bound)
    bias = jax.random.uniform(k_b, (Cout,), dtype=jnp.float32,
                              minval=-bound, maxval=bound)

    # One-time parameter repack ((Cin, Cout) bf16, transposed) — outside the hot path.
    w_mat, b_mat = prepare_params(weight, bias, compute_dtype=jnp.bfloat16)

    out = conv2d_1x1_sigmoid(x, w_mat, b_mat)
    jax.block_until_ready(out)
    assert out.shape == (N, Cout, H, W)

    # Tight check: reference computed with the SAME bf16-cast operands and f32
    # accumulation — only accumulation-order differences remain.
    x_bf = x.reshape(N, Cin).astype(jnp.bfloat16)
    logits_bf = jnp.dot(x_bf, w_mat, preferred_element_type=jnp.float32) + b_mat
    ref_bf = jax.nn.sigmoid(logits_bf).reshape(N, Cout, H, W)
    assert jnp.allclose(out, ref_bf, atol=1e-4, rtol=1e-4)

    # Loose check against the full-f32 reference (bf16 weight quantization
    # error after the sigmoid is ~1e-3; 5e-2 gives wide margin).
    ref_f32 = jax.nn.sigmoid(
        jnp.einsum("nchw,oc->nohw", x, weight.reshape(Cout, Cin))
        + bias.reshape(1, Cout, 1, 1)
    )
    assert jnp.allclose(out, ref_f32, atol=5e-2)

    print("KERNEL_OK")
</pallas_src>

<mosaic_0001>
module attributes {stable_mosaic.version = 11 : i64} {
  func.func @conv1x1_sigmoid_kernel(%arg0: memref<1x348xf32, #tpu.memory_space<vmem>>, %arg1: memref<348x1392xbf16, #tpu.memory_space<vmem>>, %arg2: memref<1x1392xf32, #tpu.memory_space<vmem>>, %arg3: memref<1x1392xf32, #tpu.memory_space<vmem>>) attributes {dimension_semantics = [], scalar_prefetch = 0 : i64, scratch_operands = 0 : i64, tpu.core_type = #tpu.core_type<tc>} {
    %c0 = arith.constant 0 : index
    %c0_0 = arith.constant 0 : index
    %0 = vector.load %arg0[%c0, %c0_0] : memref<1x348xf32, #tpu.memory_space<vmem>>, vector<1x348xf32>
    %1 = arith.truncf %0 : vector<1x348xf32> to vector<1x348xbf16>
    %c0_1 = arith.constant 0 : index
    %c0_2 = arith.constant 0 : index
    %2 = vector.load %arg1[%c0_1, %c0_2] : memref<348x1392xbf16, #tpu.memory_space<vmem>>, vector<348x1392xbf16>
    %cst = arith.constant dense<0.000000e+00> : vector<1x1392xf32>
    %3 = tpu.matmul %1, %2, %cst {dimension_numbers = #tpu.dot_dimension_numbers<[1], [0], [0], [1], [0, 0, 1, 1], [], []>} : vector<1x348xbf16>, vector<348x1392xbf16>, vector<1x1392xf32> -> vector<1x1392xf32>
    %c0_3 = arith.constant 0 : index
    %c0_4 = arith.constant 0 : index
    %4 = vector.load %arg2[%c0_3, %c0_4] : memref<1x1392xf32, #tpu.memory_space<vmem>>, vector<1x1392xf32>
    %5 = arith.addf %3, %4 : vector<1x1392xf32>
    %6 = arith.negf %5 : vector<1x1392xf32>
    %7 = math.exp %6 : vector<1x1392xf32>
    %cst_5 = arith.constant 1.000000e+00 : f32
    %8 = vector.broadcast %cst_5 : f32 to vector<1x1392xf32>
    %9 = arith.addf %8, %7 : vector<1x1392xf32>
    %10 = arith.divf %8, %9 : vector<1x1392xf32>
    %c0_6 = arith.constant 0 : index
    %c0_7 = arith.constant 0 : index
    %11 = vector.load %arg3[%c0_6, %c0_7] : memref<1x1392xf32, #tpu.memory_space<vmem>>, vector<1x1392xf32>
    tpu.vector_store %arg3[%c0_6, %c0_7], %10 {strides = array<i32>} : memref<1x1392xf32, #tpu.memory_space<vmem>>, vector<1x1392xf32>,
    return
  }
}

</mosaic_0001>

<bundles_post_ra>
// kernel: tpu_custom_call.1
= control target key start
LH: loop header
LB: loop body
LE: loop exit
PB: predicated region body
PF: predicated region fallthrough
CT: control target
= control target key end

     0   :  { %8 = vsyncpa [#allocation3], 0  ;;  %s3965_s0 = inlined_call_operand.hbm [shape: f32[1,348], index: 0, kind: input, shape index: {}]   ;;  %s3966_s1 = inlined_call_operand.hbm [shape: bf16[348,1392], index: 1, kind: input, shape index: {}]   ;;  %s3967_s2 = inlined_call_operand.hbm [shape: f32[1,1392], index: 2, kind: input, shape index: {}]   ;;  %s3968_s3 = inlined_call_operand.hbm [shape: f32[1,1392], index: 3, kind: output, shape index: {}]  }
   0x1   :  { %9 = vsyncpa [#allocation6], 0  ;;  %s26_s14 = sshll.u32 %s3966_s1, 4  ;;  %s27_s14 = int_to_ptr.hbm [resolvable:$true] %s26_s14 }
   0x2   :  { %10 = vsyncpa [#allocation4], 0  ;;  %s3703_s15 = smov [#allocation5]   ;;  %s16_s19 = sshll.u32 %s3965_s0, 4  ;;  %s17_s19 = int_to_ptr.hbm [resolvable:$true] %s16_s19 }
   0x3   :  { %s28_s16 = sshll.u32 %s3703_s15, 4  ;;  %s3704_s20 = smov 704   ;;  %s29_s16 = int_to_ptr.vmem [resolvable:$true] %s28_s16 }
   0x4   :  { %s3705_s21 = smov 44   ;;  %s3706_s22 = smov [#allocation2]  }
   0x5   :  { %34 = dma.hbm_to_vmem [thread:$0]  %s27_s14, 30976, %s29_s16, [#allocation6], %s3704_s20, %s3704_s20, %s3705_s21  }
   0x6   :  { %s18_s23 = sshll.u32 %s3706_s22, 4  ;;  %s40_s26 = sshll.u32 %s3967_s2, 4  ;;  %s19_s23 = int_to_ptr.vmem [resolvable:$true] %s18_s23  ;;  %s41_s26 = int_to_ptr.hbm [resolvable:$true] %s40_s26 }
   0x7   :  { %21 = dma.hbm_to_vmem [thread:$0]  %s17_s19, 48, %s19_s23, [#allocation3]  }
   0x8   :  { %s3707_s1 = smov [#allocation7]  }
   0x9   :  { %s42_s27 = sshll.u32 %s3707_s1, 4  ;;  %s43_s27 = int_to_ptr.vmem [resolvable:$true] %s42_s27 }
   0xa   :  { %45 = dma.hbm_to_vmem [thread:$0]  %s41_s26, 176, %s43_s27, [#allocation6]  }
   0xb   :  { %3697 = dma.done.wait [#allocation3], 48  }
   0xc   :  { %3698 = vsyncadd [#allocation3], 4294967248 }
   0xd   :  { %3699 = dma.done.wait [#allocation6], 31152  }
   0xe   :  { %3700 = vsyncadd [#allocation6], 4294936144  ;;  %vm1585_vm0 = vcmask 1045504   ;;  %v2629_v0 = vld [vmem:[#allocation5 + $0x268] sm:$0xf]  ;;  %vm1581_vm1 = vcmask 752640  }
   0xf   :  { %v3391_v1 = vld [vmem:[#allocation5 + $0x290] sm:$0xf0]  ;;  %v3386_v2 = vld [vmem:[#allocation5 + $0x26c] sm:$0xf]  ;;  %v2631_v4 = vld [vmem:[#allocation5 + $0x294] sm:$0xf0] }
  0x10   :  { %v2630_v3 = vor.u32 %v3391_v1, %v2629_v0  ;;  %v2981_v5 = vld [vmem:[#allocation5 + $0x528] sm:$0xf]  ;;  %v3479_v6 = vld [vmem:[#allocation5 + $0x550] sm:$0xf0]  ;;  %v2634_v7 = vor.u32 %v3386_v2, %v2631_v4  ;;  %v3245_v9 = vld [vmem:[#allocation5 + $0x738] sm:$0xf] }
  0x11   :  { %v2982_v8 = vor.u32 %v3479_v6, %v2981_v5  ;;  %v3545_v10 = vld [vmem:[#allocation5 + $0x760] sm:$0x30]  ;;  %v2585_v11 = vld [vmem:[#allocation5 + $0x210] sm:$0xf]  ;;  %v3380_v13 = vld [vmem:[#allocation5 + $0x238] sm:$0xf0] }
  0x12   :  { %1619 = vmatpush.bf16.msra.mxu0 %v2630_v3  ;;  %v3246_v12 = vor.u32 %v3545_v10, %v3245_v9  ;;  %v3375_v14 = vld [vmem:[#allocation5 + $0x214] sm:$0xf]  ;;  %v2587_v15 = vld [vmem:[#allocation5 + $0x23c] sm:$0xf0]  ;;  %1658 = vmatpush.bf16.msra.mxu3 %v2634_v7  ;;  %v2586_v16 = vor.u32 %v3380_v13, %v2585_v11  ;;  %v2937_v18 = vld [vmem:[#allocation5 + $0x4d0] sm:$0xf] }
  0x13   :  { %1632 = vmatpush.bf16.msra.mxu1 %v2982_v8  ;;  %v2590_v17 = vor.u32 %v3375_v14, %v2587_v15  ;;  %v3468_v19 = vld [vmem:[#allocation5 + $0x4f8] sm:$0xf0]  ;;  %v3201_v20 = vld [vmem:[#allocation5 + $0x6e0] sm:$0xf]  ;;  %v3534_v23 = vld [vmem:[#allocation5 + $0x708] sm:$0xf0] }
  0x14   :  { %v1587_v21 = vsel %vm1585_vm0, %v3246_v12, 0  ;;  %v2938_v22 = vor.u32 %v3468_v19, %v2937_v18  ;;  %v2541_v24 = vld [vmem:[#allocation5 + $0x1b8] sm:$0xf]  ;;  %v3202_v25 = vor.u32 %v3534_v23, %v3201_v20  ;;  %v3369_v26 = vld [vmem:[#allocation5 + $0x1e0] sm:$0xf0]  ;;  %vm2277_vm10 = vcmask 1040384  }
  0x15   :  { %1647 = vmatpush.bf16.msra.mxu2 %v1587_v21  ;;  %v3364_v27 = vld [vmem:[#allocation5 + $0x1bc] sm:$0xf]  ;;  %v2543_v28 = vld [vmem:[#allocation5 + $0x1e4] sm:$0xf0]  ;;  %v2542_v29 = vor.u32 %v3369_v26, %v2541_v24  ;;  %v2893_v30 = vld [vmem:[#allocation5 + $0x478] sm:$0xf] }
  0x16   :  { %1620 = vmatpush.bf16.msra.mxu0 %v2586_v16  ;;  %v3457_v31 = vld [vmem:[#allocation5 + $0x4a0] sm:$0xf0]  ;;  %v3157_v32 = vld [vmem:[#allocation5 + $0x688] sm:$0xf]  ;;  %1659 = vmatpush.bf16.msra.mxu3 %v2590_v17  ;;  %v2546_v33 = vor.u32 %v3364_v27, %v2543_v28  ;;  %v3523_v35 = vld [vmem:[#allocation5 + $0x6b0] sm:$0xf0] }
  0x17   :  { %1633 = vmatpush.bf16.msra.mxu1 %v2938_v22  ;;  %v2894_v34 = vor.u32 %v3457_v31, %v2893_v30  ;;  %v2497_v36 = vld [vmem:[#allocation5 + $0x160] sm:$0xf]  ;;  %v3358_v37 = vld [vmem:[#allocation5 + $0x188] sm:$0xf0]  ;;  %v3353_v38 = vld [vmem:[#allocation5 + $0x164] sm:$0xf]  ;;  %v3158_v41 = vor.u32 %v3523_v35, %v3157_v32 }
  0x18   :  { %v2499_v39 = vld [vmem:[#allocation5 + $0x18c] sm:$0xf0]  ;;  %v2849_v40 = vld [vmem:[#allocation5 + $0x420] sm:$0xf]  ;;  %v3446_v42 = vld [vmem:[#allocation5 + $0x448] sm:$0xf0]  ;;  %v2498_v43 = vor.u32 %v3358_v37, %v2497_v36 }
  0x19   :  { %1648 = vmatpush.bf16.msra.mxu2 %v3202_v25  ;;  %v3113_v44 = vld [vmem:[#allocation5 + $0x630] sm:$0xf]  ;;  %v3512_v45 = vld [vmem:[#allocation5 + $0x658] sm:$0xf0]  ;;  %v2502_v46 = vor.u32 %v3353_v38, %v2499_v39  ;;  %v2850_v47 = vor.u32 %v3446_v42, %v2849_v40  ;;  %v2453_v48 = vld [vmem:[#allocation5 + $0x108] sm:$0xf] }
  0x1a   :  { %1621 = vmatpush.bf16.msra.mxu0 %v2542_v29  ;;  %1660 = vmatpush.bf16.msra.mxu3 %v2546_v33  ;;  %v3347_v49 = vld [vmem:[#allocation5 + $0x130] sm:$0xf0]  ;;  %v3342_v50 = vld [vmem:[#allocation5 + $0x10c] sm:$0xf]  ;;  %v2455_v51 = vld [vmem:[#allocation5 + $0x134] sm:$0xf0]  ;;  %v3114_v54 = vor.u32 %v3512_v45, %v3113_v44 }
  0x1b   :  { %1634 = vmatpush.bf16.msra.mxu1 %v2894_v34  ;;  %v2805_v52 = vld [vmem:[#allocation5 + $0x3c8] sm:$0xf]  ;;  %v3435_v53 = vld [vmem:[#allocation5 + $0x3f0] sm:$0xf0]  ;;  %v2454_v55 = vor.u32 %v3347_v49, %v2453_v48  ;;  %v3069_v56 = vld [vmem:[#allocation5 + $0x5d8] sm:$0xf]  ;;  %v2458_v58 = vor.u32 %v3342_v50, %v2455_v51 }
  0x1c   :  { %v3501_v57 = vld [vmem:[#allocation5 + $0x600] sm:$0xf0]  ;;  %v2806_v59 = vor.u32 %v3435_v53, %v2805_v52  ;;  %v2409_v60 = vld [vmem:[#allocation5 + $0xb0] sm:$0xf]  ;;  %v3336_v61 = vld [vmem:[#allocation5 + $0xd8] sm:$0xf0] }
  0x1d   :  { %1649 = vmatpush.bf16.msra.mxu2 %v3158_v41  ;;  %v3331_v62 = vld [vmem:[#allocation5 + $0xb4] sm:$0xf]  ;;  %v2411_v63 = vld [vmem:[#allocation5 + $0xdc] sm:$0xf0]  ;;  %v2761_v0 = vld [vmem:[#allocation5 + $0x370] sm:$0xf]  ;;  %v3070_v2 = vor.u32 %v3501_v57, %v3069_v56  ;;  %v2410_v4 = vor.u32 %v3336_v61, %v2409_v60 }
  0x1e   :  { %1622 = vmatpush.bf16.msra.mxu0 %v2498_v43  ;;  %1661 = vmatpush.bf16.msra.mxu3 %v2502_v46  ;;  %v3424_v1 = vld [vmem:[#allocation5 + $0x398] sm:$0xf0]  ;;  %v3025_v3 = vld [vmem:[#allocation5 + $0x580] sm:$0xf]  ;;  %v3490_v5 = vld [vmem:[#allocation5 + $0x5a8] sm:$0xf0]  ;;  %v2414_v8 = vor.u32 %v3331_v62, %v2411_v63 }
  0x1f   :  { %1635 = vmatpush.bf16.msra.mxu1 %v2850_v47  ;;  %v3474_v6 = vld [vmem:[#allocation5 + $0x52c] sm:$0xf]  ;;  %v2983_v7 = vld [vmem:[#allocation5 + $0x554] sm:$0xf0]  ;;  %v2762_v9 = vor.u32 %v3424_v1, %v2761_v0  ;;  %v3325_v11 = vld [vmem:[#allocation5 + $0x80] sm:$0xf0]  ;;  %v3026_v16 = vor.u32 %v3490_v5, %v3025_v3 }
  0x20   :  { %v2365_v10 = vld [vmem:[#allocation5 + $0x58] sm:$0xf]  ;;  %v3320_v12 = vld [vmem:[#allocation5 + $0x5c] sm:$0xf]  ;;  %v2367_v13 = vld [vmem:[#allocation5 + $0x84] sm:$0xf0]  ;;  %v2986_v18 = vor.u32 %v3474_v6, %v2983_v7 }
  0x21   :  { %1650 = vmatpush.bf16.msra.mxu2 %v3114_v54  ;;  %v2717_v14 = vld [vmem:[#allocation5 + $0x318] sm:$0xf]  ;;  %v3413_v15 = vld [vmem:[#allocation5 + $0x340] sm:$0xf0]  ;;  %v3463_v17 = vld [vmem:[#allocation5 + $0x4d4] sm:$0xf]  ;;  %v2366_v19 = vor.u32 %v3325_v11, %v2365_v10  ;;  %v2370_v23 = vor.u32 %v3320_v12, %v2367_v13 }
  0x22   :  { %1623 = vmatpush.bf16.msra.mxu0 %v2454_v55  ;;  %1662 = vmatpush.bf16.msra.mxu3 %v2458_v58  ;;  %v2939_v20 = vld [vmem:[#allocation5 + $0x4fc] sm:$0xf0]  ;;  %v3540_v21 = vld [vmem:[#allocation5 + $0x73c] sm:$0xf]  ;;  %v3247_v22 = vld [vmem:[#allocation5 + $0x764] sm:$0x30]  ;;  %v2718_v24 = vor.u32 %v3413_v15, %v2717_v14 }
  0x23   :  { %1636 = vmatpush.bf16.msra.mxu1 %v2806_v59  ;;  %v2321_v25 = vld [vmem:[#allocation5] sm:$0xf]  ;;  %v3314_v26 = vld [vmem:[#allocation5 + $0x28] sm:$0xf0]  ;;  %v3309_v27 = vld [vmem:[#allocation5 + $0x4] sm:$0xf]  ;;  %v3250_v31 = vor.u32 %v3540_v21, %v3247_v22  ;;  %v2942_v34 = vor.u32 %v3463_v17, %v2939_v20 }
  0x24   :  { %v2323_v28 = vld [vmem:[#allocation5 + $0x2c] sm:$0xf0]  ;;  %v2673_v29 = vld [vmem:[#allocation5 + $0x2c0] sm:$0xf]  ;;  %v3402_v30 = vld [vmem:[#allocation5 + $0x2e8] sm:$0xf0]  ;;  %v2322_v35 = vor.u32 %v3314_v26, %v2321_v25 }
  0x25   :  { %1651 = vmatpush.bf16.msra.mxu2 %v3070_v2  ;;  %v2989_v32 = vld [vmem:[#allocation5 + $0x530] sm:$0xf]  ;;  %v3480_v33 = vld [vmem:[#allocation5 + $0x558] sm:$0xf0]  ;;  %v2326_v39 = vor.u32 %v3309_v27, %v2323_v28  ;;  %v2674_v40 = vor.u32 %v3402_v30, %v2673_v29  ;;  %v2895_v42 = vld [vmem:[#allocation5 + $0x4a4] sm:$0xf0] }
  0x26   :  { %1624 = vmatpush.bf16.msra.mxu0 %v2410_v4  ;;  %1663 = vmatpush.bf16.msra.mxu3 %v2414_v8  ;;  %v2637_v36 = vld [vmem:[#allocation5 + $0x270] sm:$0xf]  ;;  %v3392_v37 = vld [vmem:[#allocation5 + $0x298] sm:$0xf0]  ;;  %v2990_v45 = vor.u32 %v3480_v33, %v2989_v32  ;;  %v3529_v46 = vld [vmem:[#allocation5 + $0x6e4] sm:$0xf] }
  0x27   :  { %1637 = vmatpush.bf16.msra.mxu1 %v2762_v9  ;;  %v59_v38 = vld [vmem:[#allocation2] sm:$0x7]  ;;  %v3203_v47 = vld [vmem:[#allocation5 + $0x70c] sm:$0xf0]  ;;  %v1590_v48 = vsel %vm1585_vm0, %v3250_v31, 0  ;;  %v2638_v49 = vor.u32 %v3392_v37, %v2637_v36  ;;  %s3708_s0 = smov [#allocation8]  }
  0x28   :  { %v3452_v41 = vld [vmem:[#allocation5 + $0x47c] sm:$0xf]  ;;  %v63_v43 = vperm.slane %v59_v38, 2  ;;  %v61_v44 = vperm.slane %v59_v38, 0  ;;  %v2945_v50 = vld [vmem:[#allocation5 + $0x4d8] sm:$0xf]  ;;  %v3206_v60 = vor.u32 %v3529_v46, %v3203_v47 }
  0x29   :  { %1652 = vmatpush.bf16.msra.mxu2 %v3026_v16  ;;  %v3469_v51 = vld [vmem:[#allocation5 + $0x500] sm:$0xf0]  ;;  %v2898_v53 = vor.u32 %v3452_v41, %v2895_v42  ;;  %v2593_v54 = vld [vmem:[#allocation5 + $0x218] sm:$0xf]  ;;  %v2851_v58 = vld [vmem:[#allocation5 + $0x44c] sm:$0xf0] }
  0x2a   :  { %1625 = vmatpush.bf16.msra.mxu0 %v2366_v19  ;;  %1664 = vmatpush.bf16.msra.mxu3 %v2370_v23  ;;  %v3740_v52 = vpack.c.bf16 %v63_v43, %v63_v43  ;;  %v3381_v55 = vld [vmem:[#allocation5 + $0x240] sm:$0xf0]  ;;  %v3742_v56 = vpack.c.bf16 %v61_v44, %v61_v44  ;;  %v62_v59 = vperm.slane %v59_v38, 1  ;;  %v2946_v61 = vor.u32 %v3469_v51, %v2945_v50  ;;  %v3518_v62 = vld [vmem:[#allocation5 + $0x68c] sm:$0xf]  ;;  %s2306_s2 = sshll.u32 %s3708_s0, 4  ;;  %s2307_s2 = int_to_ptr.vmem [resolvable:$true] %s2306_s2 }
  0x2b   :  { %1638 = vmatpush.bf16.msra.mxu1 %v2718_v24  ;;  %v3441_v57 = vld [vmem:[#allocation5 + $0x424] sm:$0xf]  ;;  %v2594_v63 = vor.u32 %v3381_v55, %v2593_v54  ;;  %v3159_v0 = vld [vmem:[#allocation5 + $0x6b4] sm:$0xf0]  ;;  %v2901_v1 = vld [vmem:[#allocation5 + $0x480] sm:$0xf] }
  0x2c   :  { %3287 = vmatmul.msk.bf16.vlgmr.msra.gmra.mxu2 %vm1581_vm1, %v3740_v52  ;;  %v3458_v2 = vld [vmem:[#allocation5 + $0x4a8] sm:$0xf0]  ;;  %v3746_v3 = vpack.c.bf16 %v62_v59, %v62_v59  ;;  %v2854_v4 = vor.u32 %v3441_v57, %v2851_v58  ;;  %v2549_v5 = vld [vmem:[#allocation5 + $0x1c0] sm:$0xf]  ;;  %v2807_v8 = vld [vmem:[#allocation5 + $0x3f4] sm:$0xf0]  ;;  %v3162_v9 = vor.u32 %v3518_v62, %v3159_v0 }
  0x2d   :  { %1671 = vmatpush.bf16.msrb.mxu2 %v2986_v18  ;;  %v3370_v6 = vld [vmem:[#allocation5 + $0x1e8] sm:$0xf0]  ;;  %v2902_v10 = vor.u32 %v3458_v2, %v2901_v1  ;;  %v3507_v11 = vld [vmem:[#allocation5 + $0x634] sm:$0xf]  ;;  %v3115_v13 = vld [vmem:[#allocation5 + $0x65c] sm:$0xf0] }
  0x2e   :  { %1626 = vmatpush.bf16.msra.mxu0 %v2322_v35  ;;  %1665 = vmatpush.bf16.msra.mxu3 %v2326_v39  ;;  %v3430_v7 = vld [vmem:[#allocation5 + $0x3cc] sm:$0xf]  ;;  %v2550_v12 = vor.u32 %v3370_v6, %v2549_v5  ;;  %v2857_v14 = vld [vmem:[#allocation5 + $0x428] sm:$0xf]  ;;  %v3447_v15 = vld [vmem:[#allocation5 + $0x450] sm:$0xf0]  ;;  %v3118_v21 = vor.u32 %v3507_v11, %v3115_v13 }
  0x2f   :  { %1639 = vmatpush.bf16.msra.mxu1 %v2674_v40  ;;  %v2810_v16 = vor.u32 %v3430_v7, %v2807_v8  ;;  %v2505_v17 = vld [vmem:[#allocation5 + $0x168] sm:$0xf]  ;;  %v3359_v18 = vld [vmem:[#allocation5 + $0x190] sm:$0xf0]  ;;  %v2763_v20 = vld [vmem:[#allocation5 + $0x39c] sm:$0xf0]  ;;  %v2858_v22 = vor.u32 %v3447_v15, %v2857_v14 }
  0x30   :  { %v3419_v19 = vld [vmem:[#allocation5 + $0x374] sm:$0xf]  ;;  %v3496_v23 = vld [vmem:[#allocation5 + $0x5dc] sm:$0xf]  ;;  %v2506_v24 = vor.u32 %v3359_v18, %v2505_v17  ;;  %v3071_v25 = vld [vmem:[#allocation5 + $0x604] sm:$0xf0] }
  0x31   :  { %1672 = vmatpush.bf16.msrb.mxu2 %v2942_v34  ;;  %1627 = vmatmul.bf16.vlgmr.msra.gmra.mxu0 %v3742_v56  ;;  %v2813_v26 = vld [vmem:[#allocation5 + $0x3d0] sm:$0xf]  ;;  %v3436_v27 = vld [vmem:[#allocation5 + $0x3f8] sm:$0xf0]  ;;  %v2766_v28 = vor.u32 %v3419_v19, %v2763_v20  ;;  %v2719_v32 = vld [vmem:[#allocation5 + $0x344] sm:$0xf0]  ;;  %v3074_v35 = vor.u32 %v3496_v23, %v3071_v25 }
  0x32   :  { %1686 = vmatpush.bf16.msrb.mxu0 %v1590_v48  ;;  %1710 = vmatpush.bf16.msrb.mxu3 %v2990_v45  ;;  %v3408_v29 = vld [vmem:[#allocation5 + $0x31c] sm:$0xf]  ;;  %v2461_v30 = vld [vmem:[#allocation5 + $0x110] sm:$0xf]  ;;  %v3253_v33 = vld [vmem:[#allocation5 + $0x740] sm:$0xf]  ;;  %v2814_v36 = vor.u32 %v3436_v27, %v2813_v26 }
  0x33   :  { %1697 = vmatpush.bf16.msrb.mxu1 %v2638_v49  ;;  %1666 = vmatmul.bf16.vlgmr.msra.gmra.mxu3 %v3742_v56  ;;  %v3348_v31 = vld [vmem:[#allocation5 + $0x138] sm:$0xf0]  ;;  %v3546_v34 = vld [vmem:[#allocation5 + $0x768] sm:$0x30]  ;;  %v3485_v37 = vld [vmem:[#allocation5 + $0x584] sm:$0xf]  ;;  %v2722_v42 = vor.u32 %v3408_v29, %v2719_v32 }
  0x34   :  { %1640 = vmatmul.bf16.vlgmr.msra.gmra.mxu1 %v3746_v3  ;;  %v2462_v38 = vor.u32 %v3348_v31, %v2461_v30  ;;  %v3027_v39 = vld [vmem:[#allocation5 + $0x5ac] sm:$0xf0]  ;;  %v2769_v40 = vld [vmem:[#allocation5 + $0x378] sm:$0xf]  ;;  %v3425_v41 = vld [vmem:[#allocation5 + $0x3a0] sm:$0xf0]  ;;  %v3254_v45 = vor.u32 %v3546_v34, %v3253_v33 }
  0x35   :  { %1673 = vmatpush.bf16.msrb.mxu2 %v2898_v53  ;;  %v2417_v43 = vld [vmem:[#allocation5 + $0xb8] sm:$0xf]  ;;  %v3337_v44 = vld [vmem:[#allocation5 + $0xe0] sm:$0xf0]  ;;  %v2675_v47 = vld [vmem:[#allocation5 + $0x2ec] sm:$0xf0]  ;;  %v3030_v48 = vor.u32 %v3485_v37, %v3027_v39  ;;  %v2770_v49 = vor.u32 %v3425_v41, %v2769_v40 }
  0x36   :  { %1687 = vmatpush.bf16.msrb.mxu0 %v3206_v60  ;;  %1711 = vmatpush.bf16.msrb.mxu3 %v2946_v61  ;;  %v3397_v46 = vld [vmem:[#allocation5 + $0x2c4] sm:$0xf]  ;;  %v3387_v50 = vld [vmem:[#allocation5 + $0x274] sm:$0xf]  ;;  %v2639_v51 = vld [vmem:[#allocation5 + $0x29c] sm:$0xf0]  ;;  %v2418_v53 = vor.u32 %v3337_v44, %v2417_v43 }
  0x37   :  { %1698 = vmatpush.bf16.msrb.mxu1 %v2594_v63  ;;  %v2725_v54 = vld [vmem:[#allocation5 + $0x320] sm:$0xf]  ;;  %v3414_v55 = vld [vmem:[#allocation5 + $0x348] sm:$0xf0]  ;;  %v2678_v58 = vor.u32 %v3397_v46, %v2675_v47  ;;  %v1593_v59 = vsel %vm1585_vm0, %v3254_v45, 0  ;;  %v2642_v62 = vor.u32 %v3387_v50, %v2639_v51  ;;  %s2308_s30 = sshll.u32 %s3968_s3, 4  ;;  %s2309_s30 = int_to_ptr.hbm [resolvable:$true] %s2308_s30 }
  0x38   :  { %v2373_v57 = vld [vmem:[#allocation5 + $0x60] sm:$0xf]  ;;  %v3326_v60 = vld [vmem:[#allocation5 + $0x88] sm:$0xf0]  ;;  %v3209_v61 = vld [vmem:[#allocation5 + $0x6e8] sm:$0xf]  ;;  %v2726_v2 = vor.u32 %v3414_v55, %v2725_v54 }
  0x39   :  { %1674 = vmatpush.bf16.msrb.mxu2 %v2854_v4  ;;  %v3535_v63 = vld [vmem:[#allocation5 + $0x710] sm:$0xf0]  ;;  %v3541_v0 = vld [vmem:[#allocation5 + $0x744] sm:$0xf]  ;;  %v3255_v1 = vld [vmem:[#allocation5 + $0x76c] sm:$0x30]  ;;  %v2374_v6 = vor.u32 %v3326_v60, %v2373_v57 }
  0x3a   :  { %1688 = vmatpush.bf16.msrb.mxu0 %v3162_v9  ;;  %1712 = vmatpush.bf16.msrb.mxu3 %v2902_v10  ;;  %v3376_v4 = vld [vmem:[#allocation5 + $0x21c] sm:$0xf]  ;;  %v2595_v5 = vld [vmem:[#allocation5 + $0x244] sm:$0xf0]  ;;  %v3403_v8 = vld [vmem:[#allocation5 + $0x2f0] sm:$0xf0]  ;;  %v3210_v9 = vor.u32 %v3535_v63, %v3209_v61  ;;  %v3258_v13 = vor.u32 %v3541_v0, %v3255_v1 }
  0x3b   :  { %1699 = vmatpush.bf16.msrb.mxu1 %v2550_v12  ;;  %v2681_v7 = vld [vmem:[#allocation5 + $0x2c8] sm:$0xf]  ;;  %v3315_v11 = vld [vmem:[#allocation5 + $0x30] sm:$0xf0]  ;;  %v3165_v12 = vld [vmem:[#allocation5 + $0x690] sm:$0xf]  ;;  %v2598_v14 = vor.u32 %v3376_v4, %v2595_v5 }
  0x3c   :  { %v2329_v10 = vld [vmem:[#allocation5 + $0x8] sm:$0xf]  ;;  %v3524_v15 = vld [vmem:[#allocation5 + $0x6b8] sm:$0xf0]  ;;  %v2991_v17 = vld [vmem:[#allocation5 + $0x55c] sm:$0xf0]  ;;  %v2682_v18 = vor.u32 %v3403_v8, %v2681_v7 }
  0x3d   :  { %1675 = vmatpush.bf16.msrb.mxu2 %v2810_v16  ;;  %v3475_v16 = vld [vmem:[#allocation5 + $0x534] sm:$0xf]  ;;  %v3365_v19 = vld [vmem:[#allocation5 + $0x1c4] sm:$0xf]  ;;  %v2551_v20 = vld [vmem:[#allocation5 + $0x1ec] sm:$0xf0]  ;;  %v3166_v23 = vor.u32 %v3524_v15, %v3165_v12 }
  0x3e   :  { %1689 = vmatpush.bf16.msrb.mxu0 %v3118_v21  ;;  %1713 = vmatpush.bf16.msrb.mxu3 %v2858_v22  ;;  %v2330_v21 = vor.u32 %v3315_v11, %v2329_v10  ;;  %v3121_v22 = vld [vmem:[#allocation5 + $0x638] sm:$0xf]  ;;  %v2994_v25 = vor.u32 %v3475_v16, %v2991_v17  ;;  %v3530_v26 = vld [vmem:[#allocation5 + $0x6ec] sm:$0xf]  ;;  %v3513_v29 = vld [vmem:[#allocation5 + $0x660] sm:$0xf0] }
  0x3f   :  { %1700 = vmatpush.bf16.msrb.mxu1 %v2506_v24  ;;  %v1596_v24 = vsel %vm1585_vm0, %v3258_v13, 0  ;;  %v3211_v27 = vld [vmem:[#allocation5 + $0x714] sm:$0xf0]  ;;  %v3464_v30 = vld [vmem:[#allocation5 + $0x4dc] sm:$0xf] }
  0x40   :  { %v2947_v31 = vld [vmem:[#allocation5 + $0x504] sm:$0xf0]  ;;  %v3354_v32 = vld [vmem:[#allocation5 + $0x16c] sm:$0xf]  ;;  %v2507_v33 = vld [vmem:[#allocation5 + $0x194] sm:$0xf0]  ;;  %v3214_v34 = vor.u32 %v3530_v26, %v3211_v27 }
  0x41   :  { %1676 = vmatpush.bf16.msrb.mxu2 %v2766_v28  ;;  %v2554_v28 = vor.u32 %v3365_v19, %v2551_v20  ;;  %v3077_v37 = vld [vmem:[#allocation5 + $0x5e0] sm:$0xf]  ;;  %v2510_v40 = vor.u32 %v3354_v32, %v2507_v33  ;;  %v3502_v41 = vld [vmem:[#allocation5 + $0x608] sm:$0xf0]  ;;  %v2903_v43 = vld [vmem:[#allocation5 + $0x4ac] sm:$0xf0] }
  0x42   :  { %1690 = vmatpush.bf16.msrb.mxu0 %v3074_v35  ;;  %1714 = vmatpush.bf16.msrb.mxu3 %v2814_v36  ;;  %v3122_v35 = vor.u32 %v3513_v29, %v3121_v22  ;;  %v2950_v36 = vor.u32 %v3464_v30, %v2947_v31  ;;  %v3167_v39 = vld [vmem:[#allocation5 + $0x6bc] sm:$0xf0]  ;;  %v3343_v44 = vld [vmem:[#allocation5 + $0x114] sm:$0xf]  ;;  %v3033_v47 = vld [vmem:[#allocation5 + $0x588] sm:$0xf] }
  0x43   :  { %1701 = vmatpush.bf16.msrb.mxu1 %v2462_v38  ;;  %v3519_v38 = vld [vmem:[#allocation5 + $0x694] sm:$0xf]  ;;  %v2463_v45 = vld [vmem:[#allocation5 + $0x13c] sm:$0xf0]  ;;  %v3508_v51 = vld [vmem:[#allocation5 + $0x63c] sm:$0xf] }
  0x44   :  { %v3170_v46 = vor.u32 %v3519_v38, %v3167_v39  ;;  %v3491_v50 = vld [vmem:[#allocation5 + $0x5b0] sm:$0xf0]  ;;  %v2466_v54 = vor.u32 %v3343_v44, %v2463_v45  ;;  %v3332_v55 = vld [vmem:[#allocation5 + $0xbc] sm:$0xf]  ;;  %v3442_v57 = vld [vmem:[#allocation5 + $0x42c] sm:$0xf] }
  0x45   :  { %1677 = vmatpush.bf16.msrb.mxu2 %v2722_v42  ;;  %v3453_v42 = vld [vmem:[#allocation5 + $0x484] sm:$0xf]  ;;  %v2645_v60 = vld [vmem:[#allocation5 + $0x278] sm:$0xf]  ;;  %v3034_v0 = vor.u32 %v3491_v50, %v3033_v47  ;;  %v2375_v5 = vld [vmem:[#allocation5 + $0x8c] sm:$0xf0] }
  0x46   :  { %1691 = vmatpush.bf16.msrb.mxu0 %v3030_v48  ;;  %1715 = vmatpush.bf16.msrb.mxu3 %v2770_v49  ;;  %v3078_v48 = vor.u32 %v3502_v41, %v3077_v37  ;;  %v2906_v49 = vor.u32 %v3453_v42, %v2903_v43  ;;  %v3393_v61 = vld [vmem:[#allocation5 + $0x2a0] sm:$0xf0]  ;;  %v3431_v8 = vld [vmem:[#allocation5 + $0x3d4] sm:$0xf]  ;;  %v2601_v10 = vld [vmem:[#allocation5 + $0x220] sm:$0xf] }
  0x47   :  { %1702 = vmatpush.bf16.msrb.mxu1 %v2418_v53  ;;  %v3123_v53 = vld [vmem:[#allocation5 + $0x664] sm:$0xf0]  ;;  %v3497_v63 = vld [vmem:[#allocation5 + $0x5e4] sm:$0xf]  ;;  %v2646_v7 = vor.u32 %v3393_v61, %v2645_v60  ;;  %v3382_v11 = vld [vmem:[#allocation5 + $0x248] sm:$0xf0] }
  0x48   :  { %v3321_v4 = vld [vmem:[#allocation5 + $0x64] sm:$0xf]  ;;  %v3261_v12 = vld [vmem:[#allocation5 + $0x748] sm:$0xf]  ;;  %v3547_v13 = vld [vmem:[#allocation5 + $0x770] sm:$0x30]  ;;  %v2602_v19 = vor.u32 %v3382_v11, %v2601_v10 }
  0x49   :  { %1678 = vmatpush.bf16.msrb.mxu2 %v2678_v58  ;;  %3288 = vmatmul.msk.bf16.vlgmr.msrb.gmra.mxu0 %vm1581_vm1, %v3740_v52  ;;  %v2859_v58 = vld [vmem:[#allocation5 + $0x454] sm:$0xf0]  ;;  %v3486_v16 = vld [vmem:[#allocation5 + $0x58c] sm:$0xf]  ;;  %v2771_v22 = vld [vmem:[#allocation5 + $0x3a4] sm:$0xf0] }
  0x4a   :  { %1725 = vmatpush.bf16.msra.mxu0 %v1593_v59  ;;  %1716 = vmatpush.bf16.msrb.mxu3 %v2726_v2  ;;  %v2419_v59 = vld [vmem:[#allocation5 + $0xe4] sm:$0xf0]  ;;  %v2862_v1 = vor.u32 %v3442_v57, %v2859_v58  ;;  %v3079_v2 = vld [vmem:[#allocation5 + $0x60c] sm:$0xf0]  ;;  %v3035_v17 = vld [vmem:[#allocation5 + $0x5b4] sm:$0xf0] }
  0x4b   :  { %1703 = vmatpush.bf16.msrb.mxu1 %v2374_v6  ;;  %v2422_v6 = vor.u32 %v3332_v55, %v2419_v59  ;;  %v3310_v20 = vld [vmem:[#allocation5 + $0xc] sm:$0xf]  ;;  %v3371_v26 = vld [vmem:[#allocation5 + $0x1f0] sm:$0xf0]  ;;  %v3038_v27 = vor.u32 %v3486_v16, %v3035_v17  ;;  %v3481_v29 = vld [vmem:[#allocation5 + $0x560] sm:$0xf0] }
  0x4c   :  { %1679 = vmatmul.bf16.vlgmr.msrb.gmra.mxu2 %v3746_v3  ;;  %v3409_v31 = vld [vmem:[#allocation5 + $0x324] sm:$0xf]  ;;  %v3360_v38 = vld [vmem:[#allocation5 + $0x198] sm:$0xf0]  ;;  %v3217_v39 = vld [vmem:[#allocation5 + $0x6f0] sm:$0xf] }
  0x4d   :  { %1736 = vmatpush.bf16.msra.mxu2 %v2642_v62  ;;  %v3126_v62 = vor.u32 %v3508_v51, %v3123_v53  ;;  %v2953_v41 = vld [vmem:[#allocation5 + $0x4e0] sm:$0xf]  ;;  %v3470_v42 = vld [vmem:[#allocation5 + $0x508] sm:$0xf0]  ;;  %v2683_v47 = vld [vmem:[#allocation5 + $0x2f4] sm:$0xf0] }
  0x4e   :  { %1726 = vmatpush.bf16.msra.mxu0 %v3210_v9  ;;  %1717 = vmatpush.bf16.msrb.mxu3 %v2682_v18  ;;  %v2815_v9 = vld [vmem:[#allocation5 + $0x3fc] sm:$0xf0]  ;;  %v2378_v18 = vor.u32 %v3321_v4, %v2375_v5  ;;  %v3398_v44 = vld [vmem:[#allocation5 + $0x2cc] sm:$0xf]  ;;  %v2954_v50 = vor.u32 %v3470_v42, %v2953_v41  ;;  %v3173_v51 = vld [vmem:[#allocation5 + $0x698] sm:$0xf] }
  0x4f   :  { %1704 = vmatpush.bf16.msrb.mxu1 %v2330_v21  ;;  %v2818_v15 = vor.u32 %v3431_v8, %v2815_v9  ;;  %v3420_v21 = vld [vmem:[#allocation5 + $0x37c] sm:$0xf]  ;;  %v3525_v53 = vld [vmem:[#allocation5 + $0x6c0] sm:$0xf0]  ;;  %v3459_v55 = vld [vmem:[#allocation5 + $0x4b0] sm:$0xf0]  ;;  %v2686_v59 = vor.u32 %v3398_v44, %v2683_v47 }
  0x50   :  { %v2774_v30 = vor.u32 %v3420_v21, %v2771_v22  ;;  %v3388_v57 = vld [vmem:[#allocation5 + $0x27c] sm:$0xf]  ;;  %v2647_v58 = vld [vmem:[#allocation5 + $0x2a4] sm:$0xf0]  ;;  %v3174_v61 = vor.u32 %v3525_v53, %v3173_v51  ;;  %v2865_v4 = vld [vmem:[#allocation5 + $0x430] sm:$0xf] }
  0x51   :  { %1737 = vmatpush.bf16.msra.mxu2 %v2598_v14  ;;  %1718 = vmatmul.bf16.vlgmr.msrb.gmra.mxu3 %v3746_v3  ;;  %v3082_v14 = vor.u32 %v3497_v63, %v3079_v2  ;;  %v3338_v63 = vld [vmem:[#allocation5 + $0xe8] sm:$0xf0]  ;;  %v2650_v5 = vor.u32 %v3388_v57, %v2647_v58  ;;  %v2603_v8 = vld [vmem:[#allocation5 + $0x24c] sm:$0xf0]  ;;  %v2381_v11 = vld [vmem:[#allocation5 + $0x68] sm:$0xf] }
  0x52   :  { %1764 = vmatpush.bf16.msra.mxu3 %v1596_v24  ;;  %1727 = vmatpush.bf16.msra.mxu0 %v3166_v23  ;;  %v3262_v23 = vor.u32 %v3547_v13, %v3261_v12  ;;  %v2331_v24 = vld [vmem:[#allocation5 + $0x34] sm:$0xf0]  ;;  %v3514_v2 = vld [vmem:[#allocation5 + $0x668] sm:$0xf0]  ;;  %v3327_v12 = vld [vmem:[#allocation5 + $0x90] sm:$0xf0] }
  0x53   :  { %1749 = vmatpush.bf16.msra.mxu1 %v2994_v25  ;;  %v2557_v25 = vld [vmem:[#allocation5 + $0x1c8] sm:$0xf]  ;;  %v2334_v32 = vor.u32 %v3310_v20, %v2331_v24  ;;  %v2821_v16 = vld [vmem:[#allocation5 + $0x3d8] sm:$0xf]  ;;  %v3542_v21 = vld [vmem:[#allocation5 + $0x74c] sm:$0xf] }
  0x54   :  { %1705 = vmatmul.bf16.vlgmr.msrb.gmra.mxu1 %v3742_v56  ;;  %v2558_v33 = vor.u32 %v3371_v26, %v2557_v25  ;;  %v2559_v20 = vld [vmem:[#allocation5 + $0x1f4] sm:$0xf0]  ;;  %v2337_v25 = vld [vmem:[#allocation5 + $0x10] sm:$0xf]  ;;  %v3316_v26 = vld [vmem:[#allocation5 + $0x38] sm:$0xf0] }
  0x55   :  { %1738 = vmatpush.bf16.msra.mxu2 %v2554_v28  ;;  %v2997_v28 = vld [vmem:[#allocation5 + $0x538] sm:$0xf]  ;;  %v2733_v42 = vld [vmem:[#allocation5 + $0x328] sm:$0xf]  ;;  %v3465_v44 = vld [vmem:[#allocation5 + $0x4e4] sm:$0xf] }
  0x56   :  { %1765 = vmatpush.bf16.msra.mxu3 %v3214_v34  ;;  %1728 = vmatpush.bf16.msra.mxu0 %v3122_v35  ;;  %v1599_v34 = vsel %vm1585_vm0, %v3262_v23, 0  ;;  %v2727_v35 = vld [vmem:[#allocation5 + $0x34c] sm:$0xf0]  ;;  %v2998_v37 = vor.u32 %v3481_v29, %v2997_v28  ;;  %v3263_v22 = vld [vmem:[#allocation5 + $0x774] sm:$0x30]  ;;  %v2382_v23 = vor.u32 %v3327_v12, %v2381_v11 }
  0x57   :  { %1750 = vmatpush.bf16.msra.mxu1 %v2950_v36  ;;  %v2513_v36 = vld [vmem:[#allocation5 + $0x170] sm:$0xf]  ;;  %v2730_v43 = vor.u32 %v3409_v31, %v2727_v35  ;;  %v3492_v29 = vld [vmem:[#allocation5 + $0x5b8] sm:$0xf0]  ;;  %v3266_v35 = vor.u32 %v3542_v21, %v3263_v22  ;;  %v2471_v51 = vld [vmem:[#allocation5 + $0x144] sm:$0xf0] }
  0x58   :  { %v2514_v45 = vor.u32 %v3360_v38, %v2513_v36  ;;  %v3041_v28 = vld [vmem:[#allocation5 + $0x590] sm:$0xf]  ;;  %v3355_v36 = vld [vmem:[#allocation5 + $0x174] sm:$0xf]  ;;  %v2338_v38 = vor.u32 %v3316_v26, %v2337_v25  ;;  %v3404_v57 = vld [vmem:[#allocation5 + $0x2f8] sm:$0xf0] }
  0x59   :  { %1739 = vmatpush.bf16.msra.mxu2 %v2510_v40  ;;  %v3536_v40 = vld [vmem:[#allocation5 + $0x718] sm:$0xf0]  ;;  %v2955_v47 = vld [vmem:[#allocation5 + $0x50c] sm:$0xf0]  ;;  %v3509_v11 = vld [vmem:[#allocation5 + $0x644] sm:$0xf] }
  0x5a   :  { %1766 = vmatpush.bf16.msra.mxu3 %v3170_v46  ;;  %1729 = vmatpush.bf16.msra.mxu0 %v3078_v48  ;;  %v3218_v46 = vor.u32 %v3536_v40, %v3217_v39  ;;  %v2469_v48 = vld [vmem:[#allocation5 + $0x118] sm:$0xf]  ;;  %v3042_v39 = vor.u32 %v3492_v29, %v3041_v28  ;;  %v3432_v21 = vld [vmem:[#allocation5 + $0x3dc] sm:$0xf]  ;;  %v2823_v22 = vld [vmem:[#allocation5 + $0x404] sm:$0xf0] }
  0x5b   :  { %1751 = vmatpush.bf16.msra.mxu1 %v2906_v49  ;;  %v3349_v49 = vld [vmem:[#allocation5 + $0x140] sm:$0xf0]  ;;  %v3087_v25 = vld [vmem:[#allocation5 + $0x614] sm:$0xf0]  ;;  %v2565_v26 = vld [vmem:[#allocation5 + $0x1d0] sm:$0xf] }
  0x5c   :  { %v2470_v60 = vor.u32 %v3349_v49, %v2469_v48  ;;  %v3531_v48 = vld [vmem:[#allocation5 + $0x6f4] sm:$0xf]  ;;  %v3219_v49 = vld [vmem:[#allocation5 + $0x71c] sm:$0xf0] }
  0x5d   :  { %1740 = vmatpush.bf16.msra.mxu2 %v2466_v54  ;;  %v2909_v54 = vld [vmem:[#allocation5 + $0x488] sm:$0xf]  ;;  %v3222_v58 = vor.u32 %v3531_v48, %v3219_v49  ;;  %v3311_v28 = vld [vmem:[#allocation5 + $0x14] sm:$0xf]  ;;  %v2339_v29 = vld [vmem:[#allocation5 + $0x3c] sm:$0xf0] }
  0x5e   :  { %1767 = vmatpush.bf16.msra.mxu3 %v3126_v62  ;;  %1730 = vmatpush.bf16.msra.mxu0 %v3034_v0  ;;  %v2425_v62 = vld [vmem:[#allocation5 + $0xc0] sm:$0xf]  ;;  %v2910_v0 = vor.u32 %v3459_v55, %v2909_v54  ;;  %v2958_v54 = vor.u32 %v3465_v44, %v2955_v47  ;;  %v2689_v55 = vld [vmem:[#allocation5 + $0x2d0] sm:$0xf]  ;;  %v2961_v47 = vld [vmem:[#allocation5 + $0x4e8] sm:$0xf] }
  0x5f   :  { %1752 = vmatpush.bf16.msra.mxu1 %v2862_v1  ;;  %v3129_v1 = vld [vmem:[#allocation5 + $0x640] sm:$0xf]  ;;  %v2426_v9 = vor.u32 %v3338_v63, %v2425_v62  ;;  %v3520_v62 = vld [vmem:[#allocation5 + $0x69c] sm:$0xf]  ;;  %v3175_v63 = vld [vmem:[#allocation5 + $0x6c4] sm:$0xf0] }
  0x60   :  { %v3130_v10 = vor.u32 %v3514_v2, %v3129_v1  ;;  %v3394_v1 = vld [vmem:[#allocation5 + $0x2a8] sm:$0xf0]  ;;  %v3333_v2 = vld [vmem:[#allocation5 + $0xc4] sm:$0xf]  ;;  %v3471_v48 = vld [vmem:[#allocation5 + $0x510] sm:$0xf0] }
  0x61   :  { %1741 = vmatpush.bf16.msra.mxu2 %v2422_v6  ;;  %3289 = vmatmul.msk.bf16.vlgmr.msra.gmra.mxu0 %vm1581_vm1, %v3740_v52  ;;  %v3448_v6 = vld [vmem:[#allocation5 + $0x458] sm:$0xf0] }
  0x62   :  { %1775 = vmatpush.bf16.msrb.mxu0 %v2646_v7  ;;  %1768 = vmatpush.bf16.msra.mxu3 %v3082_v14  ;;  %v3377_v7 = vld [vmem:[#allocation5 + $0x224] sm:$0xf]  ;;  %v2866_v13 = vor.u32 %v3448_v6, %v2865_v4  ;;  %v3085_v14 = vld [vmem:[#allocation5 + $0x5e8] sm:$0xf]  ;;  %v2427_v4 = vld [vmem:[#allocation5 + $0xec] sm:$0xf0] }
  0x63   :  { %1753 = vmatpush.bf16.msra.mxu1 %v2818_v15  ;;  %v3503_v15 = vld [vmem:[#allocation5 + $0x610] sm:$0xf0]  ;;  %v2606_v17 = vor.u32 %v3377_v7, %v2603_v8  ;;  %v3178_v7 = vor.u32 %v3520_v62, %v3175_v63  ;;  %v2430_v12 = vor.u32 %v3333_v2, %v2427_v4  ;;  %v2917_v62 = vld [vmem:[#allocation5 + $0x490] sm:$0xf]  ;;  %v3460_v63 = vld [vmem:[#allocation5 + $0x4b8] sm:$0xf0] }
  0x64   :  { %v3086_v24 = vor.u32 %v3503_v15, %v3085_v14  ;;  %v2609_v14 = vld [vmem:[#allocation5 + $0x228] sm:$0xf]  ;;  %v3383_v15 = vld [vmem:[#allocation5 + $0x250] sm:$0xf0]  ;;  %v2691_v2 = vld [vmem:[#allocation5 + $0x2fc] sm:$0xf0] }
  0x65   :  { %1742 = vmatpush.bf16.msra.mxu2 %v2378_v18  ;;  %v3437_v18 = vld [vmem:[#allocation5 + $0x400] sm:$0xf0]  ;;  %v2433_v4 = vld [vmem:[#allocation5 + $0xc8] sm:$0xf] }
  0x66   :  { %1776 = vmatpush.bf16.msrb.mxu0 %v2602_v19  ;;  %1769 = vmatpush.bf16.msra.mxu3 %v3038_v27  ;;  %v3366_v19 = vld [vmem:[#allocation5 + $0x1cc] sm:$0xf]  ;;  %v2822_v27 = vor.u32 %v3437_v18, %v2821_v16 }
  0x67   :  { %1754 = vmatpush.bf16.msra.mxu1 %v2774_v30  ;;  %v2777_v30 = vld [vmem:[#allocation5 + $0x380] sm:$0xf]  ;;  %v2562_v31 = vor.u32 %v3366_v19, %v2559_v20  ;;  %v3322_v16 = vld [vmem:[#allocation5 + $0x6c] sm:$0xf]  ;;  %v2610_v20 = vor.u32 %v3383_v15, %v2609_v14  ;;  %v3449_v14 = vld [vmem:[#allocation5 + $0x460] sm:$0xf0] }
  0x69   :  { %1743 = vmatpush.bf16.msra.mxu2 %v2334_v32  ;;  %3290 = vmatmul.msk.bf16.vlgmr.msra.gmra.mxu3 %vm1581_vm1, %v3740_v52  ;;  %v3426_v32 = vld [vmem:[#allocation5 + $0x3a8] sm:$0xf0] }
  0x6a   :  { %1803 = vmatpush.bf16.msrb.mxu3 %v1599_v34  ;;  %1777 = vmatpush.bf16.msrb.mxu0 %v2558_v33  ;;  %v3476_v33 = vld [vmem:[#allocation5 + $0x53c] sm:$0xf]  ;;  %v2999_v34 = vld [vmem:[#allocation5 + $0x564] sm:$0xf0]  ;;  %v2778_v40 = vor.u32 %v3426_v32, %v2777_v30  ;;  %v3005_v30 = vld [vmem:[#allocation5 + $0x540] sm:$0xf] }
  0x6b   :  { %1755 = vmatpush.bf16.msra.mxu1 %v2730_v43  ;;  %v3002_v41 = vor.u32 %v3476_v33, %v2999_v34  ;;  %v3415_v43 = vld [vmem:[#allocation5 + $0x350] sm:$0xf0]  ;;  %v3482_v32 = vld [vmem:[#allocation5 + $0x568] sm:$0xf0]  ;;  %v3269_v33 = vld [vmem:[#allocation5 + $0x750] sm:$0xf] }
  0x6c   :  { %1744 = vmatmul.bf16.vlgmr.msra.gmra.mxu2 %v3742_v56  ;;  %v2734_v53 = vor.u32 %v3415_v43, %v2733_v42  ;;  %v3548_v34 = vld [vmem:[#allocation5 + $0x778] sm:$0x30]  ;;  %v2521_v42 = vld [vmem:[#allocation5 + $0x178] sm:$0xf]  ;;  %v3361_v43 = vld [vmem:[#allocation5 + $0x1a0] sm:$0xf0]  ;;  %v3006_v44 = vor.u32 %v3482_v32, %v3005_v30 }
  0x6d   :  { %1788 = vmatpush.bf16.msrb.mxu2 %v2998_v37  ;;  %v2515_v37 = vld [vmem:[#allocation5 + $0x19c] sm:$0xf0]  ;;  %v3317_v30 = vld [vmem:[#allocation5 + $0x40] sm:$0xf0]  ;;  %v3093_v32 = vld [vmem:[#allocation5 + $0x5f0] sm:$0xf] }
  0x6e   :  { %1778 = vmatpush.bf16.msrb.mxu0 %v2514_v45  ;;  %1804 = vmatpush.bf16.msrb.mxu3 %v3218_v46  ;;  %v1602_v45 = vsel %vm1585_vm0, %v3266_v35, 0  ;;  %v2518_v46 = vor.u32 %v3355_v36, %v2515_v37  ;;  %v3421_v37 = vld [vmem:[#allocation5 + $0x384] sm:$0xf] }
  0x6f   :  { %1756 = vmatpush.bf16.msra.mxu1 %v2686_v59 }
  0x71   :  { %1789 = vmatpush.bf16.msrb.mxu2 %v2954_v50  ;;  %v3344_v50 = vld [vmem:[#allocation5 + $0x11c] sm:$0xf] }
  0x72   :  { %1779 = vmatpush.bf16.msrb.mxu0 %v2470_v60  ;;  %1805 = vmatpush.bf16.msrb.mxu3 %v3174_v61  ;;  %v2474_v59 = vor.u32 %v3344_v50, %v2471_v51  ;;  %v3454_v60 = vld [vmem:[#allocation5 + $0x48c] sm:$0xf]  ;;  %v2911_v61 = vld [vmem:[#allocation5 + $0x4b4] sm:$0xf0]  ;;  %v2522_v50 = vor.u32 %v3361_v43, %v2521_v42 }
  0x73   :  { %1814 = vmatpush.bf16.msrb.mxu1 %v2650_v5  ;;  %v2690_v5 = vor.u32 %v3404_v57, %v2689_v55  ;;  %v2914_v6 = vor.u32 %v3454_v60, %v2911_v61  ;;  %v3410_v51 = vld [vmem:[#allocation5 + $0x32c] sm:$0xf]  ;;  %v3537_v60 = vld [vmem:[#allocation5 + $0x720] sm:$0xf0]  ;;  %v3049_v43 = vld [vmem:[#allocation5 + $0x598] sm:$0xf] }
  0x74   :  { %1757 = vmatmul.bf16.vlgmr.msra.gmra.mxu1 %v3746_v3  ;;  %v3350_v55 = vld [vmem:[#allocation5 + $0x148] sm:$0xf0] }
  0x75   :  { %1790 = vmatpush.bf16.msrb.mxu2 %v2910_v0  ;;  %v2653_v0 = vld [vmem:[#allocation5 + $0x280] sm:$0xf] }
  0x76   :  { %1780 = vmatpush.bf16.msrb.mxu0 %v2426_v9  ;;  %1806 = vmatpush.bf16.msrb.mxu3 %v3130_v10  ;;  %v2654_v8 = vor.u32 %v3394_v1, %v2653_v0  ;;  %v3443_v9 = vld [vmem:[#allocation5 + $0x434] sm:$0xf]  ;;  %v2867_v10 = vld [vmem:[#allocation5 + $0x45c] sm:$0xf0] }
  0x77   :  { %1815 = vmatpush.bf16.msrb.mxu1 %v2606_v17  ;;  %v2383_v17 = vld [vmem:[#allocation5 + $0x94] sm:$0xf0]  ;;  %v2870_v18 = vor.u32 %v3443_v9, %v2867_v10  ;;  %v3399_v1 = vld [vmem:[#allocation5 + $0x2d4] sm:$0xf]  ;;  %v2918_v9 = vor.u32 %v3460_v63, %v2917_v62  ;;  %v3181_v10 = vld [vmem:[#allocation5 + $0x6a0] sm:$0xf] }
  0x78   :  { %v2479_v62 = vld [vmem:[#allocation5 + $0x14c] sm:$0xf0]  ;;  %v3543_v63 = vld [vmem:[#allocation5 + $0x754] sm:$0xf] }
  0x79   :  { %1791 = vmatpush.bf16.msrb.mxu2 %v2866_v13  ;;  %v3131_v13 = vld [vmem:[#allocation5 + $0x66c] sm:$0xf0] }
  0x7a   :  { %1781 = vmatpush.bf16.msrb.mxu0 %v2382_v23  ;;  %1807 = vmatpush.bf16.msrb.mxu3 %v3086_v24  ;;  %v3134_v19 = vor.u32 %v3509_v11, %v3131_v13  ;;  %v3498_v23 = vld [vmem:[#allocation5 + $0x5ec] sm:$0xf]  ;;  %v2386_v24 = vor.u32 %v3322_v16, %v2383_v17  ;;  %v2873_v13 = vld [vmem:[#allocation5 + $0x438] sm:$0xf]  ;;  %v2389_v17 = vld [vmem:[#allocation5 + $0x70] sm:$0xf] }
  0x7b   :  { %1816 = vmatpush.bf16.msrb.mxu1 %v2562_v31  ;;  %v2826_v31 = vor.u32 %v3432_v21, %v2823_v22  ;;  %v3090_v35 = vor.u32 %v3498_v23, %v3087_v25  ;;  %v3526_v11 = vld [vmem:[#allocation5 + $0x6c8] sm:$0xf0]  ;;  %v2611_v21 = vld [vmem:[#allocation5 + $0x254] sm:$0xf0]  ;;  %v2874_v22 = vor.u32 %v3449_v14, %v2873_v13  ;;  %v3137_v23 = vld [vmem:[#allocation5 + $0x648] sm:$0xf] }
  0x7c   :  { %v2829_v25 = vld [vmem:[#allocation5 + $0x3e0] sm:$0xf]  ;;  %v3334_v13 = vld [vmem:[#allocation5 + $0xcc] sm:$0xf]  ;;  %v2435_v14 = vld [vmem:[#allocation5 + $0xf4] sm:$0xf0] }
  0x7d   :  { %1792 = vmatpush.bf16.msrb.mxu2 %v2822_v27  ;;  %v3372_v27 = vld [vmem:[#allocation5 + $0x1f8] sm:$0xf0] }
  0x7e   :  { %1782 = vmatpush.bf16.msrb.mxu0 %v2338_v38  ;;  %1808 = vmatpush.bf16.msrb.mxu3 %v3042_v39  ;;  %v2566_v36 = vor.u32 %v3372_v27, %v2565_v26  ;;  %v2779_v38 = vld [vmem:[#allocation5 + $0x3ac] sm:$0xf0]  ;;  %v3487_v39 = vld [vmem:[#allocation5 + $0x594] sm:$0xf]  ;;  %v3438_v26 = vld [vmem:[#allocation5 + $0x408] sm:$0xf0] }
  0x7f   :  { %1817 = vmatpush.bf16.msrb.mxu1 %v2518_v46  ;;  %v2782_v46 = vor.u32 %v3421_v37, %v2779_v38  ;;  %v3477_v37 = vld [vmem:[#allocation5 + $0x544] sm:$0xf]  ;;  %v3007_v38 = vld [vmem:[#allocation5 + $0x56c] sm:$0xf0] }
  0x81   :  { %1793 = vmatpush.bf16.msrb.mxu2 %v2778_v40  ;;  %3291 = vmatmul.msk.bf16.vlgmr.msrb.gmra.mxu3 %vm1581_vm1, %v3740_v52  ;;  %v2342_v40 = vor.u32 %v3311_v28, %v2339_v29  ;;  %v2345_v29 = vld [vmem:[#allocation5 + $0x18] sm:$0xf] }
  0x82   :  { %1827 = vmatpush.bf16.msra.mxu0 %v3002_v41  ;;  %1842 = vmatpush.bf16.msra.mxu3 %v1602_v45  ;;  %v3043_v41 = vld [vmem:[#allocation5 + $0x5bc] sm:$0xf0]  ;;  %v3270_v45 = vor.u32 %v3548_v34, %v3269_v33  ;;  %v3367_v33 = vld [vmem:[#allocation5 + $0x1d4] sm:$0xf] }
  0x83   :  { %1783 = vmatmul.bf16.vlgmr.msrb.gmra.mxu0 %v3742_v56  ;;  %1818 = vmatpush.bf16.msrb.mxu1 %v2474_v59  ;;  %v3046_v49 = vor.u32 %v3487_v39, %v3043_v41  ;;  %v3225_v59 = vld [vmem:[#allocation5 + $0x6f8] sm:$0xf]  ;;  %v2567_v34 = vld [vmem:[#allocation5 + $0x1fc] sm:$0xf0]  ;;  %v2785_v39 = vld [vmem:[#allocation5 + $0x388] sm:$0xf]  ;;  %v2346_v41 = vor.u32 %v3317_v30, %v2345_v29 }
  0x84   :  { %v1605_v57 = vsel %vm1585_vm0, %v3270_v45, 0  ;;  %v2570_v42 = vor.u32 %v3367_v33, %v2567_v34  ;;  %v3010_v45 = vor.u32 %v3477_v37, %v3007_v38  ;;  %v3433_v29 = vld [vmem:[#allocation5 + $0x3e4] sm:$0xf]  ;;  %v2831_v30 = vld [vmem:[#allocation5 + $0x40c] sm:$0xf0] }
  0x85   :  { %1794 = vmatpush.bf16.msrb.mxu2 %v2734_v53  ;;  %v2735_v53 = vld [vmem:[#allocation5 + $0x354] sm:$0xf0]  ;;  %v3362_v33 = vld [vmem:[#allocation5 + $0x1a8] sm:$0xf0]  ;;  %v3779_v37 = vld [vmem:[#allocation7] sm:$0xff]  ;;  %v2834_v38 = vor.u32 %v3433_v29, %v2831_v30 }
  0x86   :  { %1828 = vmatpush.bf16.msra.mxu0 %v2958_v54  ;;  %1843 = vmatpush.bf16.msra.mxu3 %v3222_v58  ;;  %v2477_v54 = vld [vmem:[#allocation5 + $0x120] sm:$0xf]  ;;  %v2962_v58 = vor.u32 %v3471_v48, %v2961_v47  ;;  %v2738_v61 = vor.u32 %v3410_v51, %v2735_v53  ;;  %v3356_v47 = vld [vmem:[#allocation5 + $0x17c] sm:$0xf]  ;;  %v2523_v48 = vld [vmem:[#allocation5 + $0x1a4] sm:$0xf0] }
  0x87   :  { %1819 = vmatpush.bf16.msrb.mxu1 %v2430_v12  ;;  %v2478_v0 = vor.u32 %v3350_v55, %v2477_v54  ;;  %v2694_v12 = vor.u32 %v3399_v1, %v2691_v2  ;;  %v2963_v51 = vld [vmem:[#allocation5 + $0x514] sm:$0xf0]  ;;  %v2661_v53 = vld [vmem:[#allocation5 + $0x288] sm:$0xf]  ;;  %v3395_v54 = vld [vmem:[#allocation5 + $0x2b0] sm:$0xf0] }
  0x88   :  { %v2741_v55 = vld [vmem:[#allocation5 + $0x330] sm:$0xf]  ;;  %v2662_v1 = vor.u32 %v3395_v54, %v2661_v53  ;;  %v3139_v53 = vld [vmem:[#allocation5 + $0x674] sm:$0xf0] }
  0x89   :  { %1795 = vmatpush.bf16.msrb.mxu2 %v2690_v5  ;;  %v3226_v5 = vor.u32 %v3537_v60, %v3225_v59  ;;  %v3345_v59 = vld [vmem:[#allocation5 + $0x124] sm:$0xf] }
  0x8a   :  { %1829 = vmatpush.bf16.msra.mxu0 %v2914_v6  ;;  %1844 = vmatpush.bf16.msra.mxu3 %v3178_v7  ;;  %v3339_v6 = vld [vmem:[#allocation5 + $0xf0] sm:$0xf0]  ;;  %v3389_v7 = vld [vmem:[#allocation5 + $0x284] sm:$0xf] }
  0x8b   :  { %1820 = vmatpush.bf16.msrb.mxu1 %v2386_v24  ;;  %v2434_v15 = vor.u32 %v3339_v6, %v2433_v4  ;;  %v3515_v24 = vld [vmem:[#allocation5 + $0x670] sm:$0xf0]  ;;  %v2617_v6 = vld [vmem:[#allocation5 + $0x230] sm:$0xf] }
  0x8c   :  { %1796 = vmatmul.bf16.vlgmr.msrb.gmra.mxu2 %v3746_v3  ;;  %v3455_v4 = vld [vmem:[#allocation5 + $0x494] sm:$0xf] }
  0x8d   :  { %1853 = vmatpush.bf16.msra.mxu2 %v2654_v8  ;;  %v2655_v8 = vld [vmem:[#allocation5 + $0x2ac] sm:$0xf0] }
  0x8e   :  { %1830 = vmatpush.bf16.msra.mxu0 %v2870_v18  ;;  %1845 = vmatpush.bf16.msra.mxu3 %v3134_v19  ;;  %v2658_v16 = vor.u32 %v3389_v7, %v2655_v8  ;;  %v3182_v18 = vor.u32 %v3526_v11, %v3181_v10  ;;  %v3328_v19 = vld [vmem:[#allocation5 + $0x98] sm:$0xf0]  ;;  %v2697_v8 = vld [vmem:[#allocation5 + $0x2d8] sm:$0xf]  ;;  %v2482_v10 = vor.u32 %v3345_v59, %v2479_v62  ;;  %v2743_v59 = vld [vmem:[#allocation5 + $0x35c] sm:$0xf0] }
  0x8f   :  { %1821 = vmatpush.bf16.msrb.mxu1 %v2342_v40  ;;  %v2390_v27 = vor.u32 %v3328_v19, %v2389_v17  ;;  %v3427_v40 = vld [vmem:[#allocation5 + $0x3b0] sm:$0xf0]  ;;  %v3384_v7 = vld [vmem:[#allocation5 + $0x258] sm:$0xf0]  ;;  %v2573_v19 = vld [vmem:[#allocation5 + $0x1d8] sm:$0xf] }
  0x90   :  { %v3444_v17 = vld [vmem:[#allocation5 + $0x43c] sm:$0xf] }
  0x91   :  { %1854 = vmatpush.bf16.msra.mxu2 %v2610_v20  ;;  %v3378_v20 = vld [vmem:[#allocation5 + $0x22c] sm:$0xf] }
  0x92   :  { %1831 = vmatpush.bf16.msra.mxu0 %v2826_v31  ;;  %1846 = vmatpush.bf16.msra.mxu3 %v3090_v35  ;;  %v2614_v28 = vor.u32 %v3378_v20, %v2611_v21  ;;  %v3138_v31 = vor.u32 %v3515_v24, %v3137_v23  ;;  %v2830_v35 = vor.u32 %v3438_v26, %v2829_v25  ;;  %v3373_v20 = vld [vmem:[#allocation5 + $0x200] sm:$0xf0]  ;;  %v3532_v23 = vld [vmem:[#allocation5 + $0x6fc] sm:$0xf]  ;;  %v3227_v24 = vld [vmem:[#allocation5 + $0x724] sm:$0xf0] }
  0x93   :  { %1866 = vmatpush.bf16.msra.mxu1 %v3006_v44  ;;  %v2438_v21 = vor.u32 %v3334_v13, %v2435_v14  ;;  %v3323_v26 = vld [vmem:[#allocation5 + $0x74] sm:$0xf] }
  0x94   :  { %1822 = vmatmul.bf16.vlgmr.msrb.gmra.mxu1 %v3742_v56 }
  0x95   :  { %1855 = vmatpush.bf16.msra.mxu2 %v2566_v36  ;;  %v3504_v36 = vld [vmem:[#allocation5 + $0x618] sm:$0xf0] }
  0x96   :  { %1832 = vmatpush.bf16.msra.mxu0 %v2782_v46  ;;  %1847 = vmatpush.bf16.msra.mxu3 %v3046_v49  ;;  %v3094_v44 = vor.u32 %v3504_v36, %v3093_v32  ;;  %v3493_v46 = vld [vmem:[#allocation5 + $0x5c0] sm:$0xf0]  ;;  %v2786_v49 = vor.u32 %v3427_v40, %v2785_v39  ;;  %v2529_v32 = vld [vmem:[#allocation5 + $0x180] sm:$0xf]  ;;  %v3183_v36 = vld [vmem:[#allocation5 + $0x6cc] sm:$0xf0] }
  0x97   :  { %1867 = vmatpush.bf16.msra.mxu1 %v2962_v58  ;;  %v2526_v58 = vor.u32 %v3356_v47, %v2523_v48  ;;  %v3050_v60 = vor.u32 %v3493_v46, %v3049_v43  ;;  %v3312_v39 = vld [vmem:[#allocation5 + $0x1c] sm:$0xf]  ;;  %v2347_v40 = vld [vmem:[#allocation5 + $0x44] sm:$0xf0]  ;;  %v2787_v43 = vld [vmem:[#allocation5 + $0x3b4] sm:$0xf0] }
  0x98   :  { %v2485_v47 = vld [vmem:[#allocation5 + $0x128] sm:$0xf]  ;;  %v3351_v48 = vld [vmem:[#allocation5 + $0x150] sm:$0xf0] }
  0x99   :  { %1856 = vmatpush.bf16.msra.mxu2 %v2522_v50  ;;  %3292 = vmatmul.msk.bf16.vlgmr.msra.gmra.mxu3 %vm1581_vm1, %v3740_v52  ;;  %v3466_v50 = vld [vmem:[#allocation5 + $0x4ec] sm:$0xf] }
  0x9a   :  { %1881 = vmatpush.bf16.msrb.mxu3 %v1605_v57  ;;  %1833 = vmatpush.bf16.msra.mxu0 %v2738_v61  ;;  %v3416_v57 = vld [vmem:[#allocation5 + $0x358] sm:$0xf0]  ;;  %v2966_v61 = vor.u32 %v3466_v50, %v2963_v51  ;;  %v2350_v50 = vor.u32 %v3312_v39, %v2347_v40  ;;  %v3510_v51 = vld [vmem:[#allocation5 + $0x64c] sm:$0xf]  ;;  %v3379_v39 = vld [vmem:[#allocation5 + $0x234] sm:$0xf] }
  0x9b   :  { %1868 = vmatpush.bf16.msra.mxu1 %v2918_v9  ;;  %v2742_v2 = vor.u32 %v3416_v57, %v2741_v55  ;;  %v3405_v9 = vld [vmem:[#allocation5 + $0x300] sm:$0xf0]  ;;  %v3411_v57 = vld [vmem:[#allocation5 + $0x334] sm:$0xf]  ;;  %v2619_v40 = vld [vmem:[#allocation5 + $0x25c] sm:$0xf0] }
  0x9d   :  { %1857 = vmatpush.bf16.msra.mxu2 %v2478_v0  ;;  %v3271_v0 = vld [vmem:[#allocation5 + $0x77c] sm:$0x30] }
  0x9e   :  { %1882 = vmatpush.bf16.msrb.mxu3 %v3226_v5  ;;  %1834 = vmatpush.bf16.msra.mxu0 %v2694_v12  ;;  %v2919_v5 = vld [vmem:[#allocation5 + $0x4bc] sm:$0xf0]  ;;  %v3274_v11 = vor.u32 %v3543_v63, %v3271_v0  ;;  %v3142_v63 = vor.u32 %v3510_v51, %v3139_v53  ;;  %v2441_v0 = vld [vmem:[#allocation5 + $0xd0] sm:$0xf]  ;;  %v3439_v51 = vld [vmem:[#allocation5 + $0x410] sm:$0xf0] }
  0x9f   :  { %1869 = vmatpush.bf16.msra.mxu1 %v2874_v22  ;;  %v2922_v12 = vor.u32 %v3455_v4, %v2919_v5  ;;  %v3400_v5 = vld [vmem:[#allocation5 + $0x2dc] sm:$0xf] }
  0xa0   :  { %v1608_v22 = vsel %vm1585_vm0, %v3274_v11, 0  ;;  %v2397_v11 = vld [vmem:[#allocation5 + $0x78] sm:$0xf] }
  0xa1   :  { %1858 = vmatpush.bf16.msra.mxu2 %v2434_v15  ;;  %1835 = vmatmul.bf16.vlgmr.msra.gmra.mxu0 %v3746_v3  ;;  %v2618_v15 = vor.u32 %v3384_v7, %v2617_v6  ;;  %v3499_v6 = vld [vmem:[#allocation5 + $0x5f4] sm:$0xf]  ;;  %v3095_v7 = vld [vmem:[#allocation5 + $0x61c] sm:$0xf0] }
  0xa2   :  { %1892 = vmatpush.bf16.msrb.mxu0 %v2658_v16  ;;  %1883 = vmatpush.bf16.msrb.mxu3 %v3182_v18  ;;  %v2698_v16 = vor.u32 %v3405_v9, %v2697_v8  ;;  %v2875_v18 = vld [vmem:[#allocation5 + $0x464] sm:$0xf0]  ;;  %v2746_v8 = vor.u32 %v3411_v57, %v2743_v59  ;;  %v3467_v59 = vld [vmem:[#allocation5 + $0x4f4] sm:$0xf] }
  0xa3   :  { %1870 = vmatpush.bf16.msra.mxu1 %v2830_v35  ;;  %v2878_v25 = vor.u32 %v3444_v17, %v2875_v18  ;;  %v3521_v35 = vld [vmem:[#allocation5 + $0x6a4] sm:$0xf]  ;;  %v3098_v18 = vor.u32 %v3499_v6, %v3095_v7  ;;  %v2531_v7 = vld [vmem:[#allocation5 + $0x1ac] sm:$0xf0] }
  0xa4   :  { %v3186_v46 = vor.u32 %v3521_v35, %v3183_v36  ;;  %v3549_v17 = vld [vmem:[#allocation5 + $0x780] sm:$0x30] }
  0xa5   :  { %1859 = vmatpush.bf16.msra.mxu2 %v2390_v27  ;;  %v2391_v27 = vld [vmem:[#allocation5 + $0x9c] sm:$0xf0]  ;;  %v3357_v6 = vld [vmem:[#allocation5 + $0x184] sm:$0xf] }
  0xa6   :  { %1893 = vmatpush.bf16.msrb.mxu0 %v2614_v28  ;;  %1884 = vmatpush.bf16.msrb.mxu3 %v3138_v31  ;;  %v2574_v28 = vor.u32 %v3373_v20, %v2573_v19  ;;  %v3230_v31 = vor.u32 %v3532_v23, %v3227_v24  ;;  %v2394_v34 = vor.u32 %v3323_v26, %v2391_v27  ;;  %v3329_v19 = vld [vmem:[#allocation5 + $0xa0] sm:$0xf0]  ;;  %v3390_v20 = vld [vmem:[#allocation5 + $0x28c] sm:$0xf]  ;;  %v3488_v24 = vld [vmem:[#allocation5 + $0x59c] sm:$0xf] }
  0xa7   :  { %1871 = vmatpush.bf16.msra.mxu1 %v2786_v49  ;;  %v1559_v49 = vperm.slane %v3779_v37, 0  ;;  %v2398_v30 = vor.u32 %v3329_v19, %v2397_v11  ;;  %v2927_v11 = vld [vmem:[#allocation5 + $0x4c4] sm:$0xf0] }
  0xa9   :  { %1860 = vmatpush.bf16.msra.mxu2 %v2346_v41  ;;  %v3422_v41 = vld [vmem:[#allocation5 + $0x38c] sm:$0xf] }
  0xaa   :  { %1894 = vmatpush.bf16.msrb.mxu0 %v2570_v42  ;;  %1885 = vmatpush.bf16.msrb.mxu3 %v3094_v44  ;;  %v2530_v42 = vor.u32 %v3362_v33, %v2529_v32  ;;  %v3013_v44 = vld [vmem:[#allocation5 + $0x548] sm:$0xf]  ;;  %v2790_v54 = vor.u32 %v3422_v41, %v2787_v43  ;;  %v2353_v32 = vld [vmem:[#allocation5 + $0x20] sm:$0xf]  ;;  %v3015_v43 = vld [vmem:[#allocation5 + $0x574] sm:$0xf0] }
  0xab   :  { %1872 = vmatpush.bf16.msra.mxu1 %v2742_v2  ;;  %v2881_v33 = vld [vmem:[#allocation5 + $0x440] sm:$0xf] }
  0xac   :  { %1861 = vmatmul.bf16.vlgmr.msra.gmra.mxu2 %v3742_v56 }
  0xad   :  { %1905 = vmatpush.bf16.msrb.mxu2 %v3010_v45  ;;  %v3483_v45 = vld [vmem:[#allocation5 + $0x570] sm:$0xf0] }
  0xae   :  { %1895 = vmatpush.bf16.msrb.mxu0 %v2526_v58  ;;  %1886 = vmatpush.bf16.msrb.mxu3 %v3050_v60  ;;  %v3014_v55 = vor.u32 %v3483_v45, %v3013_v44  ;;  %v2486_v58 = vor.u32 %v3351_v48, %v2485_v47  ;;  %v2969_v60 = vld [vmem:[#allocation5 + $0x4f0] sm:$0xf]  ;;  %v1628_v62 = vpop.f32.mrf.mxu0  ;;  %v3538_v47 = vld [vmem:[#allocation5 + $0x728] sm:$0xf0] }
  0xaf   :  { %1873 = vmatpush.bf16.msra.mxu1 %v2698_v16  ;;  %v1629_v2 = vadd.f32 %v1628_v62, %v1559_v49  ;;  %v3277_v16 = vld [vmem:[#allocation5 + $0x758] sm:$0xf]  ;;  %v2622_v49 = vor.u32 %v3379_v39, %v2619_v40  ;;  %v3189_v62 = vld [vmem:[#allocation5 + $0x6a8] sm:$0xf] }
  0xb1   :  { %1906 = vmatpush.bf16.msrb.mxu2 %v2966_v61  ;;  %3293 = vmatmul.msk.bf16.vlgmr.msrb.gmra.mxu3 %vm1581_vm1, %v3740_v52  ;;  %v3472_v61 = vld [vmem:[#allocation5 + $0x518] sm:$0xf0]  ;;  %v1641_v4 = vpop.f32.mrf.mxu1 }
  0xb2   :  { %1931 = vmatpush.bf16.msra.mxu3 %v2662_v1  ;;  %1896 = vmatpush.bf16.msrb.mxu0 %v2482_v10  ;;  %v3340_v1 = vld [vmem:[#allocation5 + $0xf8] sm:$0xf0]  ;;  %v2970_v9 = vor.u32 %v3472_v61, %v2969_v60  ;;  %v2699_v10 = vld [vmem:[#allocation5 + $0x304] sm:$0xf0]  ;;  %v1642_v13 = vadd.f32 %v1641_v4, %v1629_v2  ;;  %v2971_v60 = vld [vmem:[#allocation5 + $0x51c] sm:$0xf0] }
  0xb3   :  { %1920 = vmatpush.bf16.msrb.mxu1 %v1608_v22  ;;  %v2442_v14 = vor.u32 %v3340_v1, %v2441_v0  ;;  %v1654_v22 = vpop.f32.mrf.mxu2  ;;  %v2702_v26 = vor.u32 %v3400_v5, %v2699_v10  ;;  %v2793_v2 = vld [vmem:[#allocation5 + $0x390] sm:$0xf]  ;;  %v3428_v4 = vld [vmem:[#allocation5 + $0x3b8] sm:$0xf0]  ;;  %v2974_v5 = vor.u32 %v3467_v59, %v2971_v60 }
  0xb4   :  { %1874 = vmatmul.bf16.vlgmr.msra.gmra.mxu1 %v3746_v3  ;;  %v1655_v23 = vadd.f32 %v1654_v22, %v1642_v13  ;;  %v3456_v10 = vld [vmem:[#allocation5 + $0x49c] sm:$0xf]  ;;  %v3145_v13 = vld [vmem:[#allocation5 + $0x650] sm:$0xf]  ;;  %v3445_v22 = vld [vmem:[#allocation5 + $0x444] sm:$0xf] }
  0xb5   :  { %1907 = vmatpush.bf16.msrb.mxu2 %v2922_v12  ;;  %v2925_v12 = vld [vmem:[#allocation5 + $0x498] sm:$0xf]  ;;  %v2930_v19 = vor.u32 %v3456_v10, %v2927_v11  ;;  %v3235_v59 = vld [vmem:[#allocation5 + $0x72c] sm:$0xf0]  ;;  %v3412_v10 = vld [vmem:[#allocation5 + $0x33c] sm:$0xf] }
  0xb6   :  { %1932 = vmatpush.bf16.msra.mxu3 %v2618_v15  ;;  %1897 = vmatpush.bf16.msrb.mxu0 %v2438_v21  ;;  %v3461_v15 = vld [vmem:[#allocation5 + $0x4c0] sm:$0xf0]  ;;  %v2663_v21 = vld [vmem:[#allocation5 + $0x2b4] sm:$0xf0]  ;;  %v3784_v29 = vpop.f32.mrf.mxu3  ;;  %v1630_v35 = vpop.f32.mrf.mxu0 }
  0xb7   :  { %1921 = vmatpush.bf16.msrb.mxu1 %v3230_v31  ;;  %v2926_v27 = vor.u32 %v3461_v15, %v2925_v12  ;;  %v2666_v31 = vor.u32 %v3390_v20, %v2663_v21  ;;  %v2794_v12 = vor.u32 %v3428_v4, %v2793_v2  ;;  %v2534_v15 = vor.u32 %v3357_v6, %v2531_v7  ;;  %v2487_v21 = vld [vmem:[#allocation5 + $0x154] sm:$0xf0]  ;;  %v3313_v6 = vld [vmem:[#allocation5 + $0x24] sm:$0xf]  ;;  %v2355_v7 = vld [vmem:[#allocation5 + $0x4c] sm:$0xf0] }
  0xb8   :  { %v1560_v20 = vperm.slane %v3779_v37, 1  ;;  %v2625_v11 = vld [vmem:[#allocation5 + $0x238] sm:$0xf] }
  0xb9   :  { %1908 = vmatpush.bf16.msrb.mxu2 %v2878_v25  ;;  %v3051_v25 = vld [vmem:[#allocation5 + $0x5c4] sm:$0xf0]  ;;  %v1643_v41 = vpop.f32.mrf.mxu1 }
  0xba   :  { %1933 = vmatpush.bf16.msra.mxu3 %v2574_v28  ;;  %1898 = vmatpush.bf16.msrb.mxu0 %v2394_v34  ;;  %v3278_v28 = vor.u32 %v3549_v17, %v3277_v16  ;;  %v3450_v34 = vld [vmem:[#allocation5 + $0x468] sm:$0xf0]  ;;  %v3054_v36 = vor.u32 %v3488_v24, %v3051_v25  ;;  %v2749_v16 = vld [vmem:[#allocation5 + $0x338] sm:$0xf]  ;;  %v3417_v17 = vld [vmem:[#allocation5 + $0x360] sm:$0xf0]  ;;  %v1668_v40 = vadd.f32 %v3784_v29, %v1560_v20 }
  0xbb   :  { %1922 = vmatpush.bf16.msrb.mxu1 %v3186_v46  ;;  %v2882_v44 = vor.u32 %v3450_v34, %v2881_v33  ;;  %v3233_v46 = vld [vmem:[#allocation5 + $0x700] sm:$0xf]  ;;  %v1656_v57 = vpop.f32.mrf.mxu2  ;;  %v2883_v25 = vld [vmem:[#allocation5 + $0x46c] sm:$0xf0]  ;;  %v3406_v34 = vld [vmem:[#allocation5 + $0x308] sm:$0xf0] }
  0xbc   :  { %v1611_v45 = vsel %vm1585_vm0, %v3278_v28, 0  ;;  %v2750_v28 = vor.u32 %v3417_v17, %v2749_v16  ;;  %v2705_v33 = vld [vmem:[#allocation5 + $0x2e0] sm:$0xf]  ;;  %v2886_v35 = vor.u32 %v3445_v22, %v2883_v25  ;;  %v3522_v16 = vld [vmem:[#allocation5 + $0x6ac] sm:$0xf] }
  0xbd   :  { %1909 = vmatpush.bf16.msrb.mxu2 %v2834_v38  ;;  %v3318_v38 = vld [vmem:[#allocation5 + $0x48] sm:$0xf0]  ;;  %v3191_v17 = vld [vmem:[#allocation5 + $0x6d4] sm:$0xf0]  ;;  %v3484_v20 = vld [vmem:[#allocation5 + $0x578] sm:$0xf0] }
  0xbe   :  { %1934 = vmatpush.bf16.msra.mxu3 %v2530_v42  ;;  %1899 = vmatpush.bf16.msrb.mxu0 %v2350_v50  ;;  %v3478_v42 = vld [vmem:[#allocation5 + $0x54c] sm:$0xf]  ;;  %v2354_v48 = vor.u32 %v3318_v38, %v2353_v32  ;;  %v2837_v50 = vld [vmem:[#allocation5 + $0x3e8] sm:$0xf]  ;;  %v1669_v0 = vpop.f32.mrf.mxu3  ;;  %v2443_v38 = vld [vmem:[#allocation5 + $0xfc] sm:$0xf0]  ;;  %v3194_v25 = vor.u32 %v3522_v16, %v3191_v17 }
  0xbf   :  { %1923 = vmatpush.bf16.msrb.mxu1 %v3142_v63  ;;  %v3018_v53 = vor.u32 %v3478_v42, %v3015_v43  ;;  %v2838_v61 = vor.u32 %v3439_v51, %v2837_v50  ;;  %v3527_v63 = vld [vmem:[#allocation5 + $0x6d0] sm:$0xf0]  ;;  %v3434_v42 = vld [vmem:[#allocation5 + $0x3ec] sm:$0xf]  ;;  %v2839_v43 = vld [vmem:[#allocation5 + $0x414] sm:$0xf0] }
  0xc0   :  { %v2669_v51 = vld [vmem:[#allocation5 + $0x290] sm:$0xf]  ;;  %v2842_v29 = vor.u32 %v3434_v42, %v2839_v43  ;;  %v2795_v0 = vld [vmem:[#allocation5 + $0x3bc] sm:$0xf0] }
  0xc1   :  { %1910 = vmatpush.bf16.msrb.mxu2 %v2790_v54  ;;  %1900 = vmatmul.bf16.vlgmr.msrb.gmra.mxu0 %v3742_v56  ;;  %v3368_v54 = vld [vmem:[#allocation5 + $0x1dc] sm:$0xf]  ;;  %v2581_v22 = vld [vmem:[#allocation5 + $0x1e0] sm:$0xf] }
  0xc2   :  { %1944 = vmatpush.bf16.msra.mxu0 %v3014_v55  ;;  %1935 = vmatpush.bf16.msra.mxu3 %v2486_v58  ;;  %v2575_v55 = vld [vmem:[#allocation5 + $0x204] sm:$0xf0]  ;;  %v3234_v58 = vor.u32 %v3538_v47, %v3233_v46  ;;  %v3494_v46 = vld [vmem:[#allocation5 + $0x5c8] sm:$0xf0]  ;;  %v3324_v47 = vld [vmem:[#allocation5 + $0x7c] sm:$0xf] }
  0xc3   :  { %1924 = vmatpush.bf16.msrb.mxu1 %v3098_v18  ;;  %v2578_v1 = vor.u32 %v3368_v54, %v2575_v55  ;;  %v3346_v18 = vld [vmem:[#allocation5 + $0x12c] sm:$0xf]  ;;  %v1561_v54 = vperm.slane %v3779_v37, 2 }
  0xc4   :  { %v2490_v32 = vor.u32 %v3346_v18, %v2487_v21 }
  0xc5   :  { %1911 = vmatpush.bf16.msrb.mxu2 %v2746_v8  ;;  %v3298_v8 = vmul.f32 -1.442695, %v1655_v23 }
  0xc6   :  { %1945 = vmatpush.bf16.msra.mxu0 %v2970_v9  ;;  %1936 = vmatpush.bf16.msra.mxu3 %v2442_v14  ;;  %v3190_v9 = vor.u32 %v3527_v63, %v3189_v62  ;;  %v3516_v14 = vld [vmem:[#allocation5 + $0x678] sm:$0xf0]  ;;  %v1693_v23 = vpop.f32.mrf.mxu0  ;;  %v3423_v63 = vld [vmem:[#allocation5 + $0x394] sm:$0xf] }
  0xc7   :  { %1925 = vmatpush.bf16.msrb.mxu1 %v3054_v36  ;;  %3557 = vpow2.f32 %v3298_v8  ;;  %v3146_v24 = vor.u32 %v3516_v14, %v3145_v13  ;;  %v3335_v36 = vld [vmem:[#allocation5 + $0xd4] sm:$0xf]  ;;  %v2798_v14 = vor.u32 %v3423_v63, %v2795_v0 }
  0xc8   :  { %v2446_v50 = vor.u32 %v3335_v36, %v2443_v38  ;;  %v2707_v38 = vld [vmem:[#allocation5 + $0x30c] sm:$0xf0] }
  0xc9   :  { %1912 = vmatpush.bf16.msrb.mxu2 %v2702_v26  ;;  %v3544_v26 = vld [vmem:[#allocation5 + $0x75c] sm:$0xf] }
  0xca   :  { %1946 = vmatpush.bf16.msra.mxu0 %v2926_v27  ;;  %1937 = vmatpush.bf16.msra.mxu3 %v2398_v30  ;;  %v3279_v27 = vld [vmem:[#allocation5 + $0x784] sm:$0x30]  ;;  %v3101_v30 = vld [vmem:[#allocation5 + $0x5f8] sm:$0xf] }
  0xcb   :  { %1959 = vmatpush.bf16.msra.mxu1 %v1611_v45  ;;  %v3282_v39 = vor.u32 %v3544_v26, %v3279_v27  ;;  %v2706_v45 = vor.u32 %v3406_v34, %v2705_v33  ;;  %v3374_v26 = vld [vmem:[#allocation5 + $0x208] sm:$0xf0]  ;;  %v3285_v27 = vld [vmem:[#allocation5 + $0x760] sm:$0xf]  ;;  %v3401_v33 = vld [vmem:[#allocation5 + $0x2e4] sm:$0xf] }
  0xcc   :  { %1913 = vmatmul.bf16.vlgmr.msrb.gmra.mxu2 %v3746_v3  ;;  %3294 = vmatmul.msk.bf16.vlgmr.msrb.gmra.mxu1 %vm1581_vm1, %v3740_v52  ;;  %v3511_v34 = vld [vmem:[#allocation5 + $0x654] sm:$0xf]  ;;  %v2582_v42 = vor.u32 %v3374_v26, %v2581_v22 }
  0xcd   :  { %1970 = vmatpush.bf16.msra.mxu2 %v2666_v31  ;;  %v3505_v31 = vld [vmem:[#allocation5 + $0x620] sm:$0xf0]  ;;  %v1614_v57 = vsel %vm1585_vm0, %v3282_v39, 0  ;;  %v2977_v39 = vld [vmem:[#allocation5 + $0x4f8] sm:$0xf] }
  0xce   :  { %1947 = vmatpush.bf16.msra.mxu0 %v2882_v44  ;;  %1938 = vmatpush.bf16.msra.mxu3 %v2354_v48  ;;  %v3102_v41 = vor.u32 %v3505_v31, %v3101_v30  ;;  %v3057_v44 = vld [vmem:[#allocation5 + $0x5a0] sm:$0xf]  ;;  %v2399_v48 = vld [vmem:[#allocation5 + $0xa4] sm:$0xf0]  ;;  %v1695_v60 = vpop.f32.mrf.mxu0 }
  0xcf   :  { %1960 = vmatpush.bf16.msra.mxu1 %v3234_v58  ;;  %v1680_v55 = vpop.f32.mrf.mxu2  ;;  %v3533_v58 = vld [vmem:[#allocation5 + $0x704] sm:$0xf]  ;;  %v3058_v62 = vor.u32 %v3494_v46, %v3057_v44  ;;  %v2402_v4 = vor.u32 %v3324_v47, %v2399_v48  ;;  %v3363_v46 = vld [vmem:[#allocation5 + $0x1b0] sm:$0xf0]  ;;  %v2710_v48 = vor.u32 %v3401_v33, %v2707_v38  ;;  %v3330_v33 = vld [vmem:[#allocation5 + $0xa8] sm:$0xf0] }
  0xd0   :  { %v3539_v60 = vld [vmem:[#allocation5 + $0x730] sm:$0xf0]  ;;  %v2801_v38 = vld [vmem:[#allocation5 + $0x398] sm:$0xf] }
  0xd1   :  { %1971 = vmatpush.bf16.msra.mxu2 %v2622_v49  ;;  %1939 = vmatmul.bf16.vlgmr.msra.gmra.mxu3 %v3742_v56  ;;  %v3558_v49 = vpop.eup %3557 }
  0xd2   :  { %1983 = vmatpush.bf16.msrb.mxu3 %v3018_v53  ;;  %1948 = vmatpush.bf16.msra.mxu0 %v2838_v61  ;;  %v3396_v53 = vld [vmem:[#allocation5 + $0x2b8] sm:$0xf0]  ;;  %v1681_v61 = vadd.f32 %v1680_v55, %v1668_v40  ;;  %v3795_v2 = vadd.f32 1.0, %v3558_v49  ;;  %v3473_v40 = vld [vmem:[#allocation5 + $0x520] sm:$0xf0] }
  0xd3   :  { %1961 = vmatpush.bf16.msra.mxu1 %v3190_v9  ;;  %v3238_v9 = vor.u32 %v3533_v58, %v3235_v59  ;;  %v2978_v49 = vor.u32 %v3473_v40, %v2977_v39  ;;  %v3462_v55 = vld [vmem:[#allocation5 + $0x4c8] sm:$0xf0]  ;;  %v3241_v59 = vld [vmem:[#allocation5 + $0x708] sm:$0xf] }
  0xd4   :  { %v1694_v8 = vadd.f32 %v1693_v23, %v1681_v61  ;;  %3559 = vrcp.f32 %v3795_v2  ;;  %v1719_v23 = vpop.f32.mrf.mxu3  ;;  %vm2097_vm2 = vweird.f32 %v3795_v2 }
  0xd5   :  { %1972 = vmatpush.bf16.msra.mxu2 %v2578_v1  ;;  %v1706_v1 = vpop.f32.mrf.mxu1 }
  0xd6   :  { %1984 = vmatpush.bf16.msrb.mxu3 %v2974_v5  ;;  %1949 = vmatpush.bf16.msra.mxu0 %v2794_v12  ;;  %v2670_v5 = vor.u32 %v3396_v53, %v2669_v51  ;;  %v3385_v12 = vld [vmem:[#allocation5 + $0x260] sm:$0xf0]  ;;  %v1707_v13 = vadd.f32 %v1706_v1, %v1561_v54  ;;  %v3299_v18 = vmul.f32 -1.442695, %v1694_v8  ;;  %v3103_v51 = vld [vmem:[#allocation5 + $0x624] sm:$0xf0] }
  0xd7   :  { %1962 = vmatpush.bf16.msra.mxu1 %v3146_v24  ;;  %v2626_v21 = vor.u32 %v3385_v12, %v2625_v11  ;;  %v2358_v24 = vor.u32 %v3313_v6, %v2355_v7  ;;  %v1682_v36 = vpop.f32.mrf.mxu2  ;;  %v2933_v54 = vld [vmem:[#allocation5 + $0x4a0] sm:$0xf]  ;;  %v3489_v7 = vld [vmem:[#allocation5 + $0x5a4] sm:$0xf]  ;;  %v3059_v8 = vld [vmem:[#allocation5 + $0x5cc] sm:$0xf0] }
  0xd8   :  { %3561 = vpow2.f32 %v3299_v18  ;;  %v1720_v30 = vadd.f32 %v1719_v23, %v1707_v13  ;;  %v2934_v6 = vor.u32 %v3462_v55, %v2933_v54  ;;  %v2889_v11 = vld [vmem:[#allocation5 + $0x448] sm:$0xf]  ;;  %v3451_v12 = vld [vmem:[#allocation5 + $0x470] sm:$0xf0]  ;;  %v3062_v17 = vor.u32 %v3489_v7, %v3059_v8  ;;  %v2449_v18 = vld [vmem:[#allocation5 + $0xd8] sm:$0xf] }
  0xd9   :  { %1973 = vmatpush.bf16.msra.mxu2 %v2534_v15  ;;  %v2751_v15 = vld [vmem:[#allocation5 + $0x364] sm:$0xf0]  ;;  %v3440_v23 = vld [vmem:[#allocation5 + $0x418] sm:$0xf0]  ;;  %v3319_v55 = vld [vmem:[#allocation5 + $0x50] sm:$0xf0] }
  0xda   :  { %1985 = vmatpush.bf16.msrb.mxu3 %v2930_v19  ;;  %1950 = vmatpush.bf16.msra.mxu0 %v2750_v28  ;;  %v3021_v19 = vld [vmem:[#allocation5 + $0x550] sm:$0xf]  ;;  %v3550_v28 = vld [vmem:[#allocation5 + $0x788] sm:$0x30]  ;;  %v2754_v31 = vor.u32 %v3412_v10, %v2751_v15  ;;  %v3801_v47 = vpop.eup %3559  ;;  %v3528_v15 = vld [vmem:[#allocation5 + $0x6d8] sm:$0xf0] }
  0xdb   :  { %1963 = vmatpush.bf16.msra.mxu1 %v3102_v41  ;;  %v3286_v43 = vor.u32 %v3550_v28, %v3285_v27  ;;  %v2093_v63 = vmul.f32 %v3801_v47, %v3795_v2  ;;  %vm2098_vm3 = vweird.f32 %v3801_v47  ;;  %v2361_v54 = vld [vmem:[#allocation5 + $0x28] sm:$0xf] }
  0xdc   :  { %vm3830_vm6 = vmor %vm2097_vm2, %vm2098_vm3  ;;  %v2362_v7 = vor.u32 %v3319_v55, %v2361_v54  ;;  %v3065_v8 = vld [vmem:[#allocation5 + $0x5a8] sm:$0xf]  ;;  %vm2279_vm3 = vcmask 1042434  }
  0xdd   :  { %1974 = vmatpush.bf16.msra.mxu2 %v2490_v32  ;;  %v3022_v32 = vor.u32 %v3484_v20, %v3021_v19  ;;  %v1708_v41 = vpop.f32.mrf.mxu1  ;;  %v2094_v16 = vsub.f32 1.0, %v2093_v63  ;;  %v3341_v19 = vld [vmem:[#allocation5 + $0x100] sm:$0xf0]  ;;  %v2890_v20 = vor.u32 %v3451_v12, %v2889_v11 }
  0xde   :  { %1986 = vmatpush.bf16.msrb.mxu3 %v2886_v35  ;;  %1951 = vmatpush.bf16.msra.mxu0 %v2706_v45  ;;  %v3147_v35 = vld [vmem:[#allocation5 + $0x67c] sm:$0xf0]  ;;  %v2537_v45 = vld [vmem:[#allocation5 + $0x188] sm:$0xf]  ;;  %v3562_v53 = vpop.eup %3561  ;;  %v1732_v61 = vpop.f32.mrf.mxu0  ;;  %v2450_v27 = vor.u32 %v3341_v19, %v2449_v18  ;;  %v3429_v41 = vld [vmem:[#allocation5 + $0x3c0] sm:$0xf0] }
  0xdf   :  { %1964 = vmatpush.bf16.msra.mxu1 %v3058_v62  ;;  %v3150_v44 = vor.u32 %v3511_v34, %v3147_v35  ;;  %v2538_v58 = vor.u32 %v3363_v46, %v2537_v45  ;;  %v1721_v62 = vpop.f32.mrf.mxu3  ;;  %v1733_v1 = vadd.f32 %v1732_v61, %v1720_v30  ;;  %v2095_v30 = vmul.f32 %v3801_v47, %v2094_v16  ;;  %v3109_v46 = vld [vmem:[#allocation5 + $0x600] sm:$0xf]  ;;  %v2713_v16 = vld [vmem:[#allocation5 + $0x2e8] sm:$0xf] }
  0xe1   :  { %1975 = vmatpush.bf16.msra.mxu2 %v2446_v50  ;;  %1952 = vmatmul.bf16.vlgmr.msra.gmra.mxu0 %v3746_v3  ;;  %v3500_v50 = vld [vmem:[#allocation5 + $0x5fc] sm:$0xf]  ;;  %v3300_v10 = vmul.f32 -1.442695, %v1733_v1  ;;  %v2757_v1 = vld [vmem:[#allocation5 + $0x340] sm:$0xf] }
  0xe2   :  { %1998 = vmatpush.bf16.msrb.mxu0 %v1614_v57  ;;  %1987 = vmatpush.bf16.msrb.mxu3 %v2842_v29  ;;  %v3803_v29 = vadd.f32 1.0, %v3562_v53  ;;  %v1617_v57 = vsel %vm1585_vm0, %v3286_v43, 0  ;;  %v3106_v0 = vor.u32 %v3500_v50, %v3103_v51  ;;  %v2103_v43 = vand.u32 2147483648, %v3795_v2 }
  0xe3   :  { %2009 = vmatpush.bf16.msrb.mxu1 %v2670_v5  ;;  %v3352_v5 = vld [vmem:[#allocation5 + $0x158] sm:$0xf0]  ;;  %v2101_v50 = vand.u32 2147483647, %v3795_v2 }
  0xe4   :  { %3295 = vmatmul.msk.bf16.vlgmr.msra.gmra.mxu1 %vm1581_vm1, %v3740_v52  ;;  %3563 = vrcp.f32 %v3803_v29  ;;  %v2118_v34 = vand.u32 2147483648, %v3803_v29  ;;  %vm2112_vm4 = vweird.f32 %v3803_v29  ;;  %v2116_v40 = vand.u32 2147483647, %v3803_v29 }
  0xe5   :  { %1976 = vmatpush.bf16.msra.mxu2 %v2402_v4  ;;  %v2493_v4 = vld [vmem:[#allocation5 + $0x130] sm:$0xf]  ;;  %3565 = vpow2.f32 %v3300_v10  ;;  %vm2102_vm9 = vcmp.eq.f32.partialorder %v2101_v50, 8.507059e+37 }
  0xe6   :  { %1999 = vmatpush.bf16.msrb.mxu0 %v3238_v9  ;;  %1988 = vmatpush.bf16.msrb.mxu3 %v2798_v14  ;;  %v3242_v9 = vor.u32 %v3539_v60, %v3241_v59  ;;  %v2494_v13 = vor.u32 %v3352_v5, %v2493_v4  ;;  %v3197_v14 = vld [vmem:[#allocation5 + $0x6b0] sm:$0xf]  ;;  %v1734_v28 = vpop.f32.mrf.mxu0  ;;  %v2119_v59 = vor.u32 1.1754944e-38, %v2118_v34  ;;  %v2802_v60 = vor.u32 %v3429_v41, %v2801_v38 }
  0xe7   :  { %2010 = vmatpush.bf16.msrb.mxu1 %v2626_v21  ;;  %v2845_v21 = vld [vmem:[#allocation5 + $0x3f0] sm:$0xf]  ;;  %v3198_v22 = vor.u32 %v3528_v15, %v3197_v14  ;;  %vm3846_vm8 = vcmp.eq.f32.partialorder %v2116_v40, 8.507059e+37  ;;  %v2104_v4 = vor.u32 1.1754944e-38, %v2103_v43 }
  0xe8   :  { %v2846_v35 = vor.u32 %v3440_v23, %v2845_v21 }
  0xe9   :  { %1977 = vmatpush.bf16.msra.mxu2 %v2358_v24  ;;  %v3153_v24 = vld [vmem:[#allocation5 + $0x658] sm:$0xf] }
  0xea   :  { %2000 = vmatpush.bf16.msrb.mxu0 %v3194_v25  ;;  %1989 = vmatpush.bf16.msrb.mxu3 %v2754_v31  ;;  %v3517_v25 = vld [vmem:[#allocation5 + $0x680] sm:$0xf0]  ;;  %v3811_v26 = vpop.eup %3563 }
  0xeb   :  { %2011 = vmatpush.bf16.msrb.mxu1 %v2582_v42  ;;  %v2108_v31 = vmul.f32 %v3811_v26, %v3803_v29  ;;  %v3154_v36 = vor.u32 %v3517_v25, %v3153_v24  ;;  %vm2113_vm5 = vweird.f32 %v3811_v26  ;;  %v3566_v42 = vpop.eup %3565  ;;  %v3418_v29 = vld [vmem:[#allocation5 + $0x368] sm:$0xf0] }
  0xec   :  { %1978 = vmatmul.bf16.vlgmr.msra.gmra.mxu2 %v3742_v56  ;;  %v1771_v53 = vpop.f32.mrf.mxu3  ;;  %vm3841_vm7 = vmor %vm2112_vm4, %vm2113_vm5  ;;  %v3850_v62 = vadd.f32 1.0, %v3566_v42  ;;  %vm2281_vm4 = vcmask 1041408  }
  0xed   :  { %2022 = vmatpush.bf16.msrb.mxu2 %v3022_v32  ;;  %v2405_v32 = vld [vmem:[#allocation5 + $0x80] sm:$0xf]  ;;  %v2109_v39 = vsub.f32 1.0, %v2108_v31 }
  0xee   :  { %2001 = vmatpush.bf16.msrb.mxu0 %v3150_v44  ;;  %1990 = vmatpush.bf16.msrb.mxu3 %v2710_v48  ;;  %v1562_v44 = vperm.slane %v3779_v37, 3  ;;  %v2406_v45 = vor.u32 %v3330_v33, %v2405_v32  ;;  %v3506_v48 = vld [vmem:[#allocation5 + $0x628] sm:$0xf0]  ;;  %3567 = vrcp.f32 %v3850_v62  ;;  %vm2127_vm11 = vweird.f32 %v3850_v62 }
  0xef   :  { %2012 = vmatpush.bf16.msrb.mxu1 %v2538_v58  ;;  %v2110_v51 = vmul.f32 %v3811_v26, %v2109_v39  ;;  %v1745_v63 = vpop.f32.mrf.mxu2  ;;  %v2131_v39 = vand.u32 2147483647, %v3850_v62 }
  0xf0   :  { %v1746_v5 = vadd.f32 %v1745_v63, %v1562_v44 }
  0xf1   :  { %2023 = vmatpush.bf16.msrb.mxu2 %v2978_v49  ;;  %1991 = vmatmul.bf16.vlgmr.msrb.gmra.mxu3 %v3746_v3  ;;  %v2111_v2 = vadd.f32 %v3811_v26, %v2110_v51  ;;  %vm2132_vm0 = vcmp.eq.f32.partialorder %v2131_v39, 8.507059e+37 }
  0xf2   :  { %2037 = vmatpush.bf16.msra.mxu3 %v1617_v57  ;;  %2002 = vmatpush.bf16.msrb.mxu0 %v3106_v0  ;;  %v2096_v57 = vadd.f32 %v3801_v47, %v2095_v30  ;;  %v3110_v0 = vor.u32 %v3506_v48, %v3109_v46 }
  0xf3   :  { %2013 = vmatpush.bf16.msrb.mxu1 %v2494_v13  ;;  %v2115_v11 = vsel %vm3841_vm7, %v3811_v26, %v2111_v2  ;;  %v2758_v13 = vor.u32 %v3418_v29, %v2757_v1 }
  0xf4   :  { %v2100_v10 = vsel %vm3830_vm6, %v3801_v47, %v2096_v57  ;;  %v2120_v14 = vsel %vm3846_vm8, %v2119_v59, %v2115_v11  ;;  %v3568_v26 = vpop.eup %3567 }
  0xf5   :  { %2024 = vmatpush.bf16.msrb.mxu2 %v2934_v6  ;;  %v1758_v6 = vpop.f32.mrf.mxu1  ;;  %v2268_v18 = vrot.slane %v2120_v14, 7  ;;  %v2105_v19 = vsel %vm2102_vm9, %v2104_v4, %v2100_v10  ;;  %vm2128_vm12 = vweird.f32 %v3568_v26 }
  0xf6   :  { %2038 = vmatpush.bf16.msra.mxu3 %v3242_v9  ;;  %2003 = vmatpush.bf16.msrb.mxu0 %v3062_v17  ;;  %v3495_v9 = vld [vmem:[#allocation5 + $0x5d0] sm:$0xf0]  ;;  %v1759_v12 = vadd.f32 %v1758_v6, %v1746_v5  ;;  %vm3871_vm13 = vmor %vm2127_vm11, %vm2128_vm12 }
  0xf7   :  { %2014 = vmatpush.bf16.msrb.mxu1 %v2450_v27  ;;  %v3066_v15 = vor.u32 %v3495_v9, %v3065_v8  ;;  %v3407_v17 = vld [vmem:[#allocation5 + $0x310] sm:$0xf0]  ;;  %v2278_v21 = vsel %vm2277_vm10, %v2105_v19, %v2268_v18  ;;  %v1747_v24 = vpop.f32.mrf.mxu2  ;;  %v2123_v27 = vmul.f32 %v3568_v26, %v3850_v62  ;;  %v1565_v8 = vperm.slane %v3779_v37, 6 }
  0xf8   :  { %v1772_v47 = vadd.f32 %v1771_v53, %v1759_v12  ;;  %v2714_v23 = vor.u32 %v3407_v17, %v2713_v16 }
  0xf9   :  { %2025 = vmatpush.bf16.msrb.mxu2 %v2890_v20  ;;  %3296 = vmatmul.msk.bf16.vlgmr.msrb.gmra.mxu0 %vm1581_vm1, %v3740_v52  ;;  %v1773_v20 = vpop.f32.mrf.mxu3  ;;  %v2124_v32 = vsub.f32 1.0, %v2123_v27 }
  0xfa   :  { %2039 = vmatpush.bf16.msra.mxu3 %v3198_v22  ;;  %v3301_v22 = vmul.f32 -1.442695, %v1772_v47 }
  0xfb   :  { %2015 = vmatpush.bf16.msrb.mxu1 %v2406_v45  ;;  %v2125_v34 = vmul.f32 %v3568_v26, %v2124_v32 }
  0xfc   :  { %3569 = vpow2.f32 %v3301_v22 }
  0xfd   :  { %2026 = vmatpush.bf16.msrb.mxu2 %v2846_v35  ;;  %v1760_v25 = vpop.f32.mrf.mxu1  ;;  %v2126_v38 = vadd.f32 %v3568_v26, %v2125_v34 }
  0xfe   :  { %2040 = vmatpush.bf16.msra.mxu3 %v3154_v36  ;;  %v1566_v25 = vperm.slane %v3779_v37, 7 }
  0xff   :  { %2016 = vmatpush.bf16.msrb.mxu1 %v2362_v7  ;;  %v2130_v50 = vsel %vm3871_vm13, %v3568_v26, %v2126_v38  ;;  %v1564_v7 = vperm.slane %v3779_v37, 5 }
 0x100   :  { %v1784_v28 = vpop.f32.mrf.mxu0 }
 0x101   :  { %2027 = vmatpush.bf16.msrb.mxu2 %v2802_v60 }
 0x102   :  { %2041 = vmatpush.bf16.msra.mxu3 %v3110_v0  ;;  %2017 = vmatmul.bf16.vlgmr.msrb.gmra.mxu1 %v3742_v56  ;;  %v3570_v30 = vpop.eup %3569  ;;  %v1563_v56 = vperm.slane %v3779_v37, 4 }
 0x103   :  { %v2084_v31 = vadd.f32 1.0, %v3570_v30 }
 0x104   :  { %v1810_v33 = vpop.f32.mrf.mxu3  ;;  %v1785_v42 = vadd.f32 %v1784_v28, %v1563_v56 }
 0x105   :  { %2028 = vmatpush.bf16.msrb.mxu2 %v2758_v13  ;;  %3571 = vrcp.f32 %v2084_v31  ;;  %v2148_v41 = vand.u32 2147483648, %v2084_v31  ;;  %vm2142_vm14 = vweird.f32 %v2084_v31  ;;  %v2146_v44 = vand.u32 2147483647, %v2084_v31 }
 0x106   :  { %2042 = vmatpush.bf16.msra.mxu3 %v3066_v15 }
 0x107   :  { %v2149_v51 = vor.u32 1.1754944e-38, %v2148_v41  ;;  %vm2147_vm2 = vcmp.eq.f32.partialorder %v2146_v44, 8.507059e+37 }
 0x108   :  { %v1786_v35 = vpop.f32.mrf.mxu0 }
 0x109   :  { %3297 = vmatmul.msk.bf16.vlgmr.msra.gmra.mxu3 %vm1581_vm1, %v3740_v52  ;;  %2029 = vmatpush.bf16.msrb.mxu2 %v2714_v23  ;;  %v2133_v52 = vand.u32 2147483648, %v3850_v62 }
 0x10b   :  { %v3572_v36 = vpop.eup %3571  ;;  %v2134_v45 = vor.u32 1.1754944e-38, %v2133_v52 }
 0x10c   :  { %2030 = vmatmul.bf16.vlgmr.msrb.gmra.mxu2 %v3746_v3  ;;  %v2138_v3 = vmul.f32 %v3572_v36, %v2084_v31  ;;  %vm2143_vm15 = vweird.f32 %v3572_v36  ;;  %v1812_v46 = vpop.f32.mrf.mxu3 }
 0x10d   :  { %vm2144_vm1 = vmor %vm2142_vm14, %vm2143_vm15  ;;  %v2135_v57 = vsel %vm2132_vm0, %v2134_v45, %v2130_v50 }
 0x10e   :  { %v2139_v43 = vsub.f32 1.0, %v2138_v3  ;;  %v2269_v2 = vrot.slane %v2135_v57, 6 }
 0x10f   :  { %v1797_v49 = vpop.f32.mrf.mxu2 }
 0x110   :  { %v2140_v48 = vmul.f32 %v3572_v36, %v2139_v43  ;;  %v1798_v53 = vadd.f32 %v1797_v49, %v1785_v42 }
 0x111   :  { %v1823_v59 = vpop.f32.mrf.mxu1 }
 0x112   :  { %v2141_v54 = vadd.f32 %v3572_v36, %v2140_v48  ;;  %v1811_v55 = vadd.f32 %v1810_v33, %v1798_v53  ;;  %v1824_v9 = vadd.f32 %v1823_v59, %v1564_v7 }
 0x114   :  { %v2145_v58 = vsel %vm2144_vm1, %v3572_v36, %v2141_v54  ;;  %v3302_v20 = vmul.f32 -1.442695, %v1811_v55 }
 0x115   :  { %v2150_v60 = vsel %vm2147_vm2, %v2149_v51, %v2145_v58 }
 0x116   :  { %v2270_v61 = vrot.slane %v2150_v60, 5 }
 0x117   :  { %v1799_v62 = vpop.f32.mrf.mxu2 }
 0x118   :  { %v2280_v63 = vsel %vm2279_vm3, %v2269_v2, %v2270_v61 }
 0x119   :  { %v3878_v0 = vsel %vm2281_vm4, %v2278_v21, %v2280_v63  ;;  %v1825_v29 = vpop.f32.mrf.mxu1 }
 0x11c   :  { %v1849_v1 = vpop.f32.mrf.mxu3 }
 0x11e   :  { %v1836_v4 = vpop.f32.mrf.mxu0 }
 0x11f   :  { %v1837_v12 = vadd.f32 %v1836_v4, %v1824_v9 }
 0x121   :  { %v1850_v16 = vadd.f32 %v1849_v1, %v1837_v12 }
 0x123   :  { %v3303_v47 = vmul.f32 -1.442695, %v1850_v16 }
 0x124   :  { %v1851_v5 = vpop.f32.mrf.mxu3 }
 0x125   :  { %3573 = vpow2.f32 %v3303_v47 }
 0x126   :  { %v1838_v6 = vpop.f32.mrf.mxu0  ;;  %3575 = vpow2.f32 %v3302_v20 }
 0x12b   :  { %v3574_v24 = vpop.eup %3573 }
 0x12c   :  { %v3576_v27 = vpop.eup %3575  ;;  %v2086_v30 = vadd.f32 1.0, %v3574_v24 }
 0x12d   :  { %v3883_v31 = vadd.f32 1.0, %v3576_v27 }
 0x12e   :  { %vm2172_vm5 = vweird.f32 %v2086_v30  ;;  %v2176_v60 = vand.u32 2147483647, %v2086_v30  ;;  %v2178_v2 = vand.u32 2147483648, %v2086_v30 }
 0x12f   :  { %v1862_v10 = vpop.f32.mrf.mxu2  ;;  %vm2157_vm7 = vweird.f32 %v3883_v31  ;;  %v2161_v1 = vand.u32 2147483647, %v3883_v31  ;;  %v2163_v29 = vand.u32 2147483648, %v3883_v31 }
 0x130   :  { %v1863_v11 = vadd.f32 %v1862_v10, %v1565_v8  ;;  %vm3931_vm14 = vcmp.eq.f32.partialorder %v2176_v60, 8.507059e+37 }
 0x131   :  { %v1875_v13 = vpop.f32.mrf.mxu1  ;;  %vm2162_vm2 = vcmp.eq.f32.partialorder %v2161_v1, 8.507059e+37 }
 0x132   :  { %v1876_v15 = vadd.f32 %v1875_v13, %v1863_v11  ;;  %v2179_v11 = vor.u32 1.1754944e-38, %v2178_v2 }
 0x134   :  { %v1888_v14 = vpop.f32.mrf.mxu3 }
 0x135   :  { %v1889_v18 = vadd.f32 %v1888_v14, %v1876_v15 }
 0x137   :  { %v1864_v17 = vpop.f32.mrf.mxu2  ;;  %v3304_v22 = vmul.f32 -1.442695, %v1889_v18  ;;  %v2164_v18 = vor.u32 1.1754944e-38, %v2163_v29 }
 0x139   :  { %v1877_v19 = vpop.f32.mrf.mxu1  ;;  %3577 = vpow2.f32 %v3304_v22 }
 0x13a   :  { %3579 = vrcp.f32 %v2086_v30  ;;  %v335_v19 = vld [vmem:[#allocation7 + $0x8] sm:$0x7] }
 0x13b   :  { %3581 = vrcp.f32 %v3883_v31  ;;  %v1568_v22 = vperm.slane %v335_v19, 1 }
 0x13c   :  { %v1890_v21 = vpop.f32.mrf.mxu3 }
 0x13e   :  { %v1901_v23 = vpop.f32.mrf.mxu0 }
 0x13f   :  { %v3578_v28 = vpop.eup %3577  ;;  %v1902_v32 = vadd.f32 %v1901_v23, %v1566_v25 }
 0x140   :  { %v3885_v34 = vadd.f32 1.0, %v3578_v28  ;;  %v3889_v52 = vpop.eup %3579  ;;  %v1567_v28 = vperm.slane %v335_v19, 0 }
 0x141   :  { %v3893_v3 = vpop.eup %3581  ;;  %v2168_v41 = vmul.f32 %v3889_v52, %v2086_v30  ;;  %vm2173_vm6 = vweird.f32 %v3889_v52 }
 0x142   :  { %3583 = vrcp.f32 %v3885_v34  ;;  %v2153_v43 = vmul.f32 %v3893_v3, %v3883_v31  ;;  %vm2158_vm8 = vweird.f32 %v3893_v3  ;;  %vm3913_vm9 = vmor %vm2172_vm5, %vm2173_vm6  ;;  %vm2187_vm11 = vweird.f32 %v3885_v34 }
 0x143   :  { %v2169_v45 = vsub.f32 1.0, %v2168_v41  ;;  %v2193_v4 = vand.u32 2147483648, %v3885_v34  ;;  %vm3925_vm13 = vmor %vm2157_vm7, %vm2158_vm8  ;;  %v2191_v8 = vand.u32 2147483647, %v3885_v34  ;;  %vm2283_vm7 = vcmask 1044484  }
 0x144   :  { %v2154_v49 = vsub.f32 1.0, %v2153_v43  ;;  %vm2285_vm8 = vcmask 1046534  }
 0x145   :  { %v2170_v54 = vmul.f32 %v3889_v52, %v2169_v45  ;;  %v2194_v47 = vor.u32 1.1754944e-38, %v2193_v4  ;;  %vm2192_vm3 = vcmp.eq.f32.partialorder %v2191_v8, 8.507059e+37 }
 0x146   :  { %v1903_v26 = vpop.f32.mrf.mxu0  ;;  %v2155_v57 = vmul.f32 %v3893_v3, %v2154_v49 }
 0x147   :  { %v2171_v59 = vadd.f32 %v3889_v52, %v2170_v54 }
 0x148   :  { %v3895_v40 = vpop.eup %3583  ;;  %v2156_v63 = vadd.f32 %v3893_v3, %v2155_v57 }
 0x149   :  { %v1927_v33 = vpop.f32.mrf.mxu1  ;;  %v2183_v44 = vmul.f32 %v3895_v40, %v3885_v34  ;;  %vm2188_vm12 = vweird.f32 %v3895_v40  ;;  %v2175_v14 = vsel %vm3913_vm9, %v3889_v52, %v2171_v59  ;;  %vm2287_vm9 = vcmask 1045508  }
 0x14a   :  { %vm3935_vm15 = vmor %vm2187_vm11, %vm2188_vm12  ;;  %v2160_v20 = vsel %vm3925_vm13, %v3893_v3, %v2156_v63  ;;  %v2180_v25 = vsel %vm3931_vm14, %v2179_v11, %v2175_v14  ;;  %vm2289_vm11 = vcmask 1043456   ;;  %v1569_v59 = vperm.slane %v335_v19, 2 }
 0x14b   :  { %v2184_v53 = vsub.f32 1.0, %v2183_v44  ;;  %v2165_v30 = vsel %vm2162_vm2, %v2164_v18, %v2160_v20  ;;  %v2272_v34 = vrot.slane %v2180_v25, 3 }
 0x14d   :  { %v2185_v58 = vmul.f32 %v3895_v40, %v2184_v53 }
 0x14f   :  { %v1914_v56 = vpop.f32.mrf.mxu2  ;;  %v2186_v7 = vadd.f32 %v3895_v40, %v2185_v58 }
 0x150   :  { %v1915_v35 = vadd.f32 %v1914_v56, %v1902_v32 }
 0x151   :  { %v1929_v38 = vpop.f32.mrf.mxu1  ;;  %v2190_v23 = vsel %vm3935_vm15, %v3895_v40, %v2186_v7 }
 0x152   :  { %v1928_v36 = vadd.f32 %v1927_v33, %v1915_v35  ;;  %v2195_v31 = vsel %vm2192_vm3, %v2194_v47, %v2190_v23  ;;  %v2271_v35 = vrot.slane %v2165_v30, 4 }
 0x154   :  { %v3305_v37 = vmul.f32 -1.442695, %v1928_v36  ;;  %v3891_v39 = vpop.f32.mrf.mxu3  ;;  %v2273_v36 = vrot.slane %v2195_v31, 2  ;;  %v2284_v41 = vsel %vm2283_vm7, %v2271_v35, %v2272_v34  ;;  %v2296_v34 = vlaneseq }
 0x156   :  { %3585 = vpow2.f32 %v3305_v37  ;;  %v1941_v37 = vadd.f32 %v3891_v39, %v1567_v28 }
 0x157   :  { %v1916_v42 = vpop.f32.mrf.mxu2 }
 0x15c   :  { %v3586_v46 = vpop.eup %3585  ;;  %v1942_v48 = vpop.f32.mrf.mxu3 }
 0x15d   :  { %v2088_v50 = vadd.f32 1.0, %v3586_v46 }
 0x15e   :  { %v3902_v51 = vpop.f32.mrf.mxu0 }
 0x15f   :  { %3587 = vrcp.f32 %v2088_v50  ;;  %v2208_v13 = vand.u32 2147483648, %v2088_v50  ;;  %vm2202_vm0 = vweird.f32 %v2088_v50  ;;  %v2206_v16 = vand.u32 2147483647, %v2088_v50 }
 0x160   :  { %v1954_v48 = vadd.f32 %v3902_v51, %v1941_v37 }
 0x161   :  { %v3905_v55 = vpop.f32.mrf.mxu1  ;;  %v2209_v24 = vor.u32 1.1754944e-38, %v2208_v13  ;;  %vm2207_vm6 = vcmp.eq.f32.partialorder %v2206_v16, 8.507059e+37 }
 0x165   :  { %v3588_v62 = vpop.eup %3587 }
 0x166   :  { %v1955_v5 = vpop.f32.mrf.mxu0  ;;  %v2198_v9 = vmul.f32 %v3588_v62, %v2088_v50  ;;  %vm2203_vm1 = vweird.f32 %v3588_v62  ;;  %v1967_v50 = vadd.f32 %v3905_v55, %v1954_v48 }
 0x167   :  { %vm2204_vm5 = vmor %vm2202_vm0, %vm2203_vm1 }
 0x168   :  { %v2199_v15 = vsub.f32 1.0, %v2198_v9  ;;  %v3306_v39 = vmul.f32 -1.442695, %v1967_v50 }
 0x169   :  { %v1968_v17 = vpop.f32.mrf.mxu1 }
 0x16a   :  { %v2200_v21 = vmul.f32 %v3588_v62, %v2199_v15 }
 0x16c   :  { %v2201_v26 = vadd.f32 %v3588_v62, %v2200_v21 }
 0x16e   :  { %v2205_v33 = vsel %vm2204_vm5, %v3588_v62, %v2201_v26 }
 0x16f   :  { %v1979_v27 = vpop.f32.mrf.mxu2  ;;  %v2210_v56 = vsel %vm2207_vm6, %v2209_v24, %v2205_v33 }
 0x170   :  { %v1980_v32 = vadd.f32 %v1979_v27, %v1568_v22  ;;  %v2274_v52 = vrot.slane %v2210_v56, 1 }
 0x172   :  { %v2286_v42 = vsel %vm2285_vm8, %v2273_v36, %v2274_v52 }
 0x173   :  { %v2288_v43 = vsel %vm2287_vm9, %v2284_v41, %v2286_v42  ;;  %vm2298_vm9 = vcmp.lt.s32.totalorder %v2296_v34, 368 }
 0x174   :  { %v1992_v38 = vpop.f32.mrf.mxu3  ;;  %v2290_v46 = vsel %vm2289_vm11, %v3878_v0, %v2288_v43 }
 0x175   :  { %v1993_v3 = vadd.f32 %v1992_v38, %v1980_v32  ;;  %2295 = vst [vmem:[#allocation8] sm:$0xff] %v2290_v46 }
 0x176   :  { %v2005_v40 = vpop.f32.mrf.mxu0 }
 0x177   :  { %v2006_v44 = vadd.f32 %v2005_v40, %v1993_v3  ;;  %v1981_v45 = vpop.f32.mrf.mxu2 }
 0x179   :  { %v3307_v49 = vmul.f32 -1.442695, %v2006_v44 }
 0x17b   :  { %3589 = vpow2.f32 %v3307_v49 }
 0x17c   :  { %v1994_v53 = vpop.f32.mrf.mxu3  ;;  %3591 = vpow2.f32 %v3306_v39 }
 0x17e   :  { %v2007_v54 = vpop.f32.mrf.mxu0 }
 0x17f   :  { %v2018_v57 = vpop.f32.mrf.mxu1 }
 0x180   :  { %v2019_v61 = vadd.f32 %v2018_v57, %v1569_v59 }
 0x181   :  { %v3590_v58 = vpop.eup %3589 }
 0x182   :  { %v2090_v60 = vadd.f32 1.0, %v3590_v58  ;;  %v3592_v63 = vpop.eup %3591 }
 0x183   :  { %v2089_v51 = vadd.f32 1.0, %v3592_v63 }
 0x184   :  { %3593 = vrcp.f32 %v2090_v60  ;;  %v2238_v15 = vand.u32 2147483648, %v2090_v60  ;;  %vm2232_vm12 = vweird.f32 %v2090_v60  ;;  %v2236_v47 = vand.u32 2147483647, %v2090_v60 }
 0x185   :  { %3595 = vrcp.f32 %v2089_v51  ;;  %vm2217_vm15 = vweird.f32 %v2089_v51  ;;  %v2223_v22 = vand.u32 2147483648, %v2089_v51  ;;  %v2221_v25 = vand.u32 2147483647, %v2089_v51 }
 0x186   :  { %v2239_v19 = vor.u32 1.1754944e-38, %v2238_v15  ;;  %vm2237_vm1 = vcmp.eq.f32.partialorder %v2236_v47, 8.507059e+37 }
 0x187   :  { %v2020_v2 = vpop.f32.mrf.mxu1  ;;  %v2224_v32 = vor.u32 1.1754944e-38, %v2223_v22  ;;  %vm2222_vm6 = vcmp.eq.f32.partialorder %v2221_v25, 8.507059e+37 }
 0x18a   :  { %v3594_v4 = vpop.eup %3593 }
 0x18b   :  { %v2228_v6 = vmul.f32 %v3594_v4, %v2090_v60  ;;  %v3596_v8 = vpop.eup %3595  ;;  %vm2233_vm13 = vweird.f32 %v3594_v4 }
 0x18c   :  { %v2044_v62 = vpop.f32.mrf.mxu3  ;;  %v2213_v11 = vmul.f32 %v3596_v8, %v2089_v51  ;;  %vm2234_vm14 = vmor %vm2232_vm12, %vm2233_vm13  ;;  %vm2218_vm0 = vweird.f32 %v3596_v8 }
 0x18d   :  { %v2229_v9 = vsub.f32 1.0, %v2228_v6  ;;  %vm3954_vm2 = vmor %vm2217_vm15, %vm2218_vm0 }
 0x18e   :  { %v2214_v14 = vsub.f32 1.0, %v2213_v11 }
 0x18f   :  { %v2031_v0 = vpop.f32.mrf.mxu2  ;;  %v2230_v13 = vmul.f32 %v3594_v4, %v2229_v9 }
 0x190   :  { %v2032_v1 = vadd.f32 %v2031_v0, %v2019_v61  ;;  %v2215_v18 = vmul.f32 %v3596_v8, %v2214_v14 }
 0x191   :  { %v2231_v16 = vadd.f32 %v3594_v4, %v2230_v13 }
 0x192   :  { %v2045_v29 = vadd.f32 %v2044_v62, %v2032_v1  ;;  %v2216_v24 = vadd.f32 %v3596_v8, %v2215_v18 }
 0x193   :  { %v2235_v21 = vsel %vm2234_vm14, %v3594_v4, %v2231_v16 }
 0x194   :  { %v3308_v55 = vmul.f32 -1.442695, %v2045_v29  ;;  %v2046_v5 = vpop.f32.mrf.mxu3  ;;  %v2240_v30 = vsel %vm2237_vm1, %v2239_v19, %v2235_v21  ;;  %v2220_v56 = vsel %vm3954_vm2, %v3596_v8, %v2216_v24 }
 0x195   :  { %v2275_v36 = vrot.slane %v2240_v30, 7  ;;  %v2225_v38 = vsel %vm2222_vm6, %v2224_v32, %v2220_v56 }
 0x196   :  { %3597 = vpow2.f32 %v3308_v55 }
 0x197   :  { %v2033_v7 = vpop.f32.mrf.mxu2  ;;  %v2291_v40 = vsel %vm2277_vm10, %v2225_v38, %v2275_v36 }
 0x19c   :  { %v3598_v10 = vpop.eup %3597 }
 0x19d   :  { %v2091_v12 = vadd.f32 1.0, %v3598_v10 }
 0x19f   :  { %3599 = vrcp.f32 %v2091_v12  ;;  %v2253_v26 = vand.u32 2147483648, %v2091_v12  ;;  %v2251_v31 = vand.u32 2147483647, %v2091_v12  ;;  %vm2247_vm5 = vweird.f32 %v2091_v12 }
 0x1a1   :  { %v2254_v35 = vor.u32 1.1754944e-38, %v2253_v26  ;;  %vm2252_vm8 = vcmp.eq.f32.partialorder %v2251_v31, 8.507059e+37 }
 0x1a5   :  { %v3600_v17 = vpop.eup %3599 }
 0x1a6   :  { %v2243_v20 = vmul.f32 %v3600_v17, %v2091_v12  ;;  %vm2248_vm3 = vweird.f32 %v3600_v17 }
 0x1a7   :  { %vm2249_vm7 = vmor %vm2247_vm5, %vm2248_vm3 }
 0x1a8   :  { %v2244_v23 = vsub.f32 1.0, %v2243_v20 }
 0x1aa   :  { %v2245_v28 = vmul.f32 %v3600_v17, %v2244_v23 }
 0x1ac   :  { %v2246_v33 = vadd.f32 %v3600_v17, %v2245_v28 }
 0x1ae   :  { %v2250_v52 = vsel %vm2249_vm7, %v3600_v17, %v2246_v33 }
 0x1af   :  { %v2255_v37 = vsel %vm2252_vm8, %v2254_v35, %v2250_v52 }
 0x1b0   :  { %v2276_v3 = vrot.slane %v2255_v37, 6 }
 0x1b2   :  { %v2292_v41 = vsel %vm2281_vm4, %v2291_v40, %v2276_v3 }
 0x1b3   :  { %2300 = vst.msk [vmem:[#allocation8 + $0x8] sm:$0x7] %vm2298_vm9, %v2292_v41 }
 0x1b4   :  { %2311 = dma.vmem_to_hbm [thread:$0]  %s2307_s2, 176, %s2309_s30, [#allocation4]  }
 0x1b5   :  { %3701 = dma.done.wait [#allocation4], 176  }
 0x1b6   :  { %3702 = vsyncadd [#allocation4], 4294967120 }
 0x1b7   :  { %2316 = vsyncpa [#allocation3], 1 }
 0x1b8   :  { %2317 = vsyncpa [#allocation6], 1 }
 0x1b9   :  { %2318 = vsyncpa [#allocation4], 1 }

</bundles_post_ra>
